<compile_context>
chip_gen: v7x
topology: tpu7x:2x2x1
jax: 0.10.0
libtpu: 0.0.40
codegen_flags: <defaults>
</compile_context>

<pallas_src>
import functools
import math

import jax
import jax.numpy as jnp
from jax import lax
from jax.experimental import pallas as pl
from jax.experimental.pallas import tpu as pltpu

EPS = 1e-5
_GELU_C = math.sqrt(2.0 / math.pi)   # tanh-approx GELU constants
_GELU_A = 0.044715


def _round_up(x, m):
    return (x + m - 1) // m * m


def _residual_ff_kernel(x_ref, g_ref, beta_ref, w1_ref, b1_ref, w2_ref, b2_ref,
                        o_ref, acc_ref, *, n_chunks):
    # x_ref block: (1, dim, t_blk) -- NCT layout, features on sublanes,
    # time positions on lanes.
    x = x_ref[0].astype(jnp.float32)                         # (dim, t_blk)

    # LayerNorm over the feature axis (axis 0 in this orientation).
    mu = jnp.mean(x, axis=0, keepdims=True)                  # (1, t_blk)
    xc = x - mu
    var = jnp.mean(xc * xc, axis=0, keepdims=True)
    y = xc * lax.rsqrt(var + EPS)
    y = (y * g_ref[...] + beta_ref[...]).astype(jnp.bfloat16)  # (dim, t_blk)

    acc_ref[...] = jnp.zeros_like(acc_ref)

    # fc1 -> GELU -> fc2 chunked over the hidden dim: the (hidden, t_blk)
    # intermediate never materializes and GELU (VPU/EUP) overlaps the second
    # matmul (MXU).
    def _chunk(c, carry):
        # fc1 chunk (1x1 conv, dim -> h_chunk): bf16 MXU, f32 accumulate.
        h = jnp.dot(w1_ref[c], y, preferred_element_type=jnp.float32) + b1_ref[c]
        hb = h.astype(jnp.bfloat16)
        # tanh-approx GELU in bf16 (EUP tanh instead of the erf VALU
        # polynomial).  TODO(synk): deviates ~1e-3 from PyTorch nn.GELU's
        # exact-erf default; accepted per perf review.
        g = 0.5 * hb * (1.0 + jnp.tanh(_GELU_C * (hb + _GELU_A * hb * hb * hb)))
        # fc2 chunk (h_chunk -> dim); res_scale already folded into w2/b2.
        acc_ref[...] += jnp.dot(w2_ref[c], g, preferred_element_type=jnp.float32)
        return carry

    _ = lax.fori_loop(0, n_chunks, _chunk, 0, unroll=True)

    # TODO(synk): dropout omitted (inference / eval mode -> identity).
    o_ref[0] = (x + acc_ref[...] + b2_ref[...]).astype(o_ref.dtype)


def _const_spec(shape, single_buffer):
    """Whole-array BlockSpec with a constant index_map (fetched once)."""
    ndim = len(shape)
    idx = lambda b, t: (0,) * ndim
    if single_buffer:
        try:
            # Constant index_map -> one buffer suffices; halves weight VMEM.
            return pl.BlockSpec(shape, idx, pipeline_mode=pl.Buffered(1))
        except Exception:
            pass  # JAX version without pipeline_mode / Buffered
    return pl.BlockSpec(shape, idx)


def residual_ff(x_nct, params, *, res_scale=0.1, t_blk=512, h_chunk=512,
                single_buffer_weights=True):
    """x_nct: (B, dim, T) float32, matching the PyTorch Conv1d layout."""
    B, dim, T = x_nct.shape
    hidden = params["fc1_w"].shape[0]

    # ---- time tiling: lane-dense blocks (multiple of 128) ----
    t_blk = max(128, _round_up(t_blk, 128))
    t_blk_eff = min(t_blk, _round_up(T, 128))
    # Prefer >= 4 grid steps so both v7x TensorCores get work on small B*T.
    while t_blk_eff > 128 and B * pl.cdiv(T, t_blk_eff) < 4:
        t_blk_eff = max(128, (t_blk_eff // 2) // 128 * 128)
    T_pad = _round_up(T, t_blk_eff)
    x_in = x_nct if T_pad == T else jnp.pad(
        x_nct, ((0, 0), (0, 0), (0, T_pad - T)))

    # ---- hidden chunking (pad hidden to a chunk multiple; padded fc1 rows
    # and padded fc2 columns are zero, so they contribute nothing) ----
    h_chunk = max(128, _round_up(h_chunk, 128))
    h_chunk_eff = min(h_chunk, _round_up(hidden, 128))
    H_pad = _round_up(hidden, h_chunk_eff)
    n_chunks = H_pad // h_chunk_eff
    # TODO(synk): dim is not padded to a 256 multiple (it feeds the LayerNorm
    # statistics); pad + mask the LN if MXU fill on odd dims ever matters.

    # ---- parameters: PyTorch-native layouts, res_scale folded into fc2,
    # matmul operands pre-cast to bf16, hidden-chunk axis made leading ----
    w1 = params["fc1_w"].astype(jnp.float32)                 # (hidden, dim)
    b1 = params["fc1_b"].astype(jnp.float32)                 # (hidden,)
    w2 = params["fc2_w"].astype(jnp.float32) * res_scale     # (dim, hidden)
    b2 = params["fc2_b"].astype(jnp.float32) * res_scale     # (dim,)
    if H_pad != hidden:
        w1 = jnp.pad(w1, ((0, H_pad - hidden), (0, 0)))
        b1 = jnp.pad(b1, ((0, H_pad - hidden),))
        w2 = jnp.pad(w2, ((0, 0), (0, H_pad - hidden)))
    w1_r = w1.reshape(n_chunks, h_chunk_eff, dim).astype(jnp.bfloat16)
    b1_r = b1.reshape(n_chunks, h_chunk_eff, 1)
    w2_r = (w2.reshape(dim, n_chunks, h_chunk_eff)
              .transpose(1, 0, 2).astype(jnp.bfloat16))
    b2_r = b2.reshape(dim, 1)
    gamma = params["ln_gamma"].reshape(dim, 1).astype(jnp.float32)
    beta = params["ln_beta"].reshape(dim, 1).astype(jnp.float32)

    # ---- VMEM budget: actual tile/weight sizes + slack, clamped to the
    # chip's physical VMEM (64 MiB on v7x, 128 MiB on v5e/v6e) ----
    f32b = 4
    weight_bytes = ((w1_r.size + w2_r.size) * 2
                    + (b1_r.size + b2_r.size + gamma.size + beta.size) * f32b)
    est = (2 * weight_bytes                                    # worst case: double-buffered
           + 2 * 2 * dim * t_blk_eff * x_nct.dtype.itemsize    # x / out, double-buffered
           + dim * t_blk_eff * f32b                            # f32 accumulator scratch
           + 6 * h_chunk_eff * t_blk_eff * f32b                # fc1 / GELU intermediates
           + (8 << 20))                                        # compiler internal slack
    try:
        phys_vmem = pltpu.get_tpu_info().vmem_capacity_bytes
    except Exception:
        phys_vmem = 64 << 20                                   # safe cross-chip default
    vmem_limit = int(min(max(est, 32 << 20), int(phys_vmem * 0.9)))

    kernel = functools.partial(_residual_ff_kernel, n_chunks=n_chunks)
    x_spec = pl.BlockSpec((1, dim, t_blk_eff), lambda b, t: (b, 0, t))
    args = (x_in, gamma, beta, w1_r, b1_r, w2_r, b2_r)

    def _build(single_buffer):
        in_specs = [x_spec] + [_const_spec(a.shape, single_buffer)
                               for a in args[1:]]
        return pl.pallas_call(
            kernel,
            out_shape=jax.ShapeDtypeStruct((B, dim, T_pad), x_nct.dtype),
            grid_spec=pltpu.PrefetchScalarGridSpec(
                num_scalar_prefetch=0,
                grid=(B, T_pad // t_blk_eff),
                in_specs=in_specs,
                out_specs=x_spec,
                scratch_shapes=[pltpu.VMEM((dim, t_blk_eff), jnp.float32)]),
            compiler_params=pltpu.CompilerParams(
                dimension_semantics=("parallel", "parallel"),
                vmem_limit_bytes=vmem_limit),
        )

    if single_buffer_weights:
        try:
            out = _build(True)(*args)
        except Exception:
            out = _build(False)(*args)   # JAX without Buffered(1) support
    else:
        out = _build(False)(*args)

    return out if T_pad == T else out[:, :, :T]


def init_params(key, dim, hidden, zero_fc2=True):
    """PyTorch-layout params. zero_fc2=True matches the module's __init__."""
    k1, k2, k3, k4 = jax.random.split(key, 4)
    bound1 = 1.0 / math.sqrt(dim)        # Conv1d fan_in = dim * kernel_size(1)
    fc1_w = jax.random.uniform(k1, (hidden, dim), jnp.float32, -bound1, bound1)
    fc1_b = jax.random.uniform(k2, (hidden,), jnp.float32, -bound1, bound1)
    if zero_fc2:
        fc2_w = jnp.zeros((dim, hidden), jnp.float32)
        fc2_b = jnp.zeros((dim,), jnp.float32)
    else:  # arbitrary (trained-like) weights to exercise the full compute path
        bound2 = 1.0 / math.sqrt(hidden)
        fc2_w = jax.random.uniform(k3, (dim, hidden), jnp.float32, -bound2, bound2)
        fc2_b = jax.random.uniform(k4, (dim,), jnp.float32, -bound2, bound2)
    return {
        "ln_gamma": jnp.ones((dim,), jnp.float32),
        "ln_beta": jnp.zeros((dim,), jnp.float32),
        "fc1_w": fc1_w, "fc1_b": fc1_b,
        "fc2_w": fc2_w, "fc2_b": fc2_b,
    }


def _reference(x_nct, params, res_scale=0.1):
    """Pure-JAX f32 reference (exact-erf GELU, like PyTorch nn.GELU)."""
    x = jnp.transpose(x_nct, (0, 2, 1))                      # (B, T, dim)
    mu = jnp.mean(x, axis=-1, keepdims=True)
    var = jnp.mean((x - mu) ** 2, axis=-1, keepdims=True)
    y = (x - mu) / jnp.sqrt(var + EPS)
    y = y * params["ln_gamma"] + params["ln_beta"]
    h = y @ params["fc1_w"].T + params["fc1_b"]
    h = 0.5 * h * (1.0 + lax.erf(h / jnp.sqrt(2.0)))
    z = h @ params["fc2_w"].T + params["fc2_b"]
    out = x + z * res_scale
    return jnp.transpose(out, (0, 2, 1))


if __name__ == "__main__":
    B, dim, T, hidden = 2, 32, 16, 64
    key = jax.random.PRNGKey(0)
    kx, kp = jax.random.split(key)
    x = jax.random.normal(kx, (B, dim, T), jnp.float32)

    # 1) Module-default init (fc2 zero-initialized): out == x, tight tolerance.
    p0 = init_params(kp, dim, hidden, zero_fc2=True)
    out0 = jax.block_until_ready(residual_ff(x, p0, res_scale=0.1))
    ref0 = _reference(x, p0, res_scale=0.1)
    assert out0.shape == (B, dim, T)
    assert jnp.allclose(out0, ref0, atol=1e-5, rtol=1e-5), "mismatch (zero fc2)"

    # 2) Arbitrary (trained-like) weights: full compute path.  Tolerance is
    #    loose because MXU operands / GELU are bf16 and the GELU is the tanh
    #    approximation (vs PyTorch's exact erf).
    p1 = init_params(kp, dim, hidden, zero_fc2=False)
    out1 = jax.block_until_ready(residual_ff(x, p1, res_scale=0.1))
    ref1 = _reference(x, p1, res_scale=0.1)
    assert out1.shape == (B, dim, T)
    assert jnp.allclose(out1, ref1, atol=2e-2, rtol=2e-2), "mismatch (random fc2)"

    print("KERNEL_OK")
</pallas_src>

<mosaic_0001>
module attributes {stable_mosaic.version = 11 : i64} {
  func.func @_residual_ff_kernel(%arg0: i32, %arg1: i32, %arg2: memref<1x32x128xf32, #tpu.memory_space<vmem>>, %arg3: memref<32x1xf32, #tpu.memory_space<vmem>>, %arg4: memref<32x1xf32, #tpu.memory_space<vmem>>, %arg5: memref<1x128x32xbf16, #tpu.memory_space<vmem>>, %arg6: memref<1x128x1xf32, #tpu.memory_space<vmem>>, %arg7: memref<1x32x128xbf16, #tpu.memory_space<vmem>>, %arg8: memref<32x1xf32, #tpu.memory_space<vmem>>, %arg9: memref<1x32x128xf32, #tpu.memory_space<vmem>>, %arg10: memref<32x128xf32, #tpu.memory_space<vmem>>) attributes {dimension_semantics = [#tpu.dimension_semantics<parallel>, #tpu.dimension_semantics<parallel>], iteration_bounds = array<i64: 2, 1>, scalar_prefetch = 0 : i64, scratch_operands = 1 : i64, tpu.core_type = #tpu.core_type<tc>, window_params = [{transform_indices = @transform_0, window_bounds = array<i64: 1, 32, 128>}, {pipeline_mode = #tpu.pipeline_mode<synchronous>, transform_indices = @transform_1, window_bounds = array<i64: 32, 1>}, {pipeline_mode = #tpu.pipeline_mode<synchronous>, transform_indices = @transform_2, window_bounds = array<i64: 32, 1>}, {pipeline_mode = #tpu.pipeline_mode<synchronous>, transform_indices = @transform_3, window_bounds = array<i64: 1, 128, 32>}, {pipeline_mode = #tpu.pipeline_mode<synchronous>, transform_indices = @transform_4, window_bounds = array<i64: 1, 128, 1>}, {pipeline_mode = #tpu.pipeline_mode<synchronous>, transform_indices = @transform_5, window_bounds = array<i64: 1, 32, 128>}, {pipeline_mode = #tpu.pipeline_mode<synchronous>, transform_indices = @transform_6, window_bounds = array<i64: 32, 1>}, {transform_indices = @transform_7, window_bounds = array<i64: 1, 32, 128>}]} {
    %c0 = arith.constant 0 : index
    %c0_0 = arith.constant 0 : index
    %c0_1 = arith.constant 0 : index
    %0 = vector.load %arg2[%c0, %c0_0, %c0_1] : memref<1x32x128xf32, #tpu.memory_space<vmem>>, vector<1x32x128xf32>
    %1 = vector.shape_cast %0 : vector<1x32x128xf32> to vector<32x128xf32>
    %cst = arith.constant dense<0.000000e+00> : vector<128xf32>
    %2 = vector.multi_reduction <add>, %1, %cst [0] : vector<32x128xf32> to vector<128xf32>
    %3 = vector.shape_cast %2 : vector<128xf32> to vector<1x128xf32>
    %cst_2 = arith.constant 3.200000e+01 : f32
    %4 = vector.broadcast %cst_2 : f32 to vector<1x128xf32>
    %5 = arith.divf %3, %4 : vector<1x128xf32>
    %6 = vector.broadcast %5 : vector<1x128xf32> to vector<32x128xf32>
    %7 = arith.subf %1, %6 : vector<32x128xf32>
    %8 = arith.mulf %7, %7 : vector<32x128xf32>
    %cst_3 = arith.constant dense<0.000000e+00> : vector<128xf32>
    %9 = vector.multi_reduction <add>, %8, %cst_3 [0] : vector<32x128xf32> to vector<128xf32>
    %10 = vector.shape_cast %9 : vector<128xf32> to vector<1x128xf32>
    %cst_4 = arith.constant 3.200000e+01 : f32
    %11 = vector.broadcast %cst_4 : f32 to vector<1x128xf32>
    %12 = arith.divf %10, %11 : vector<1x128xf32>
    %cst_5 = arith.constant 9.99999974E-6 : f32
    %13 = vector.broadcast %cst_5 : f32 to vector<1x128xf32>
    %14 = arith.addf %12, %13 : vector<1x128xf32>
    %15 = math.rsqrt %14 : vector<1x128xf32>
    %16 = vector.broadcast %15 : vector<1x128xf32> to vector<32x128xf32>
    %17 = arith.mulf %7, %16 : vector<32x128xf32>
    %c0_6 = arith.constant 0 : index
    %c0_7 = arith.constant 0 : index
    %18 = vector.load %arg3[%c0_6, %c0_7] : memref<32x1xf32, #tpu.memory_space<vmem>>, vector<32x1xf32>
    %19 = vector.broadcast %18 : vector<32x1xf32> to vector<32x128xf32>
    %20 = arith.mulf %17, %19 : vector<32x128xf32>
    %c0_8 = arith.constant 0 : index
    %c0_9 = arith.constant 0 : index
    %21 = vector.load %arg4[%c0_8, %c0_9] : memref<32x1xf32, #tpu.memory_space<vmem>>, vector<32x1xf32>
    %22 = vector.broadcast %21 : vector<32x1xf32> to vector<32x128xf32>
    %23 = arith.addf %20, %22 : vector<32x128xf32>
    %24 = arith.truncf %23 : vector<32x128xf32> to vector<32x128xbf16>
    %cst_10 = arith.constant 0.000000e+00 : f32
    %25 = vector.broadcast %cst_10 : f32 to vector<32x128xf32>
    %c0_11 = arith.constant 0 : index
    %c0_12 = arith.constant 0 : index
    %26 = vector.load %arg10[%c0_11, %c0_12] : memref<32x128xf32, #tpu.memory_space<vmem>>, vector<32x128xf32>
    tpu.vector_store %arg10[%c0_11, %c0_12], %25 {strides = array<i32>} : memref<32x128xf32, #tpu.memory_space<vmem>>, vector<32x128xf32>,
    %c0_i32 = arith.constant 0 : i32
    %27 = arith.index_cast %c0_i32 : i32 to index
    %c0_13 = arith.constant 0 : index
    %c0_14 = arith.constant 0 : index
    %28 = vector.load %arg5[%27, %c0_13, %c0_14] : memref<1x128x32xbf16, #tpu.memory_space<vmem>>, vector<1x128x32xbf16>
    %29 = vector.shape_cast %28 : vector<1x128x32xbf16> to vector<128x32xbf16>
    %cst_15 = arith.constant dense<0.000000e+00> : vector<128x128xf32>
    %30 = tpu.matmul %29, %24, %cst_15 {dimension_numbers = #tpu.dot_dimension_numbers<[1], [0], [0], [1], [0, 0, 1, 1], [], []>} : vector<128x32xbf16>, vector<32x128xbf16>, vector<128x128xf32> -> vector<128x128xf32>
    %31 = arith.index_cast %c0_i32 : i32 to index
    %c0_16 = arith.constant 0 : index
    %c0_17 = arith.constant 0 : index
    %32 = vector.load %arg6[%31, %c0_16, %c0_17] : memref<1x128x1xf32, #tpu.memory_space<vmem>>, vector<1x128x1xf32>
    %33 = vector.shape_cast %32 : vector<1x128x1xf32> to vector<128x1xf32>
    %34 = vector.broadcast %33 : vector<128x1xf32> to vector<128x128xf32>
    %35 = arith.addf %30, %34 : vector<128x128xf32>
    %36 = arith.truncf %35 : vector<128x128xf32> to vector<128x128xbf16>
    %cst_18 = arith.constant 5.000000e-01 : bf16
    %37 = vector.broadcast %cst_18 : bf16 to vector<128x128xbf16>
    %38 = arith.mulf %37, %36 : vector<128x128xbf16>
    %cst_19 = arith.constant 4.467770e-02 : bf16
    %39 = vector.broadcast %cst_19 : bf16 to vector<128x128xbf16>
    %40 = arith.mulf %39, %36 : vector<128x128xbf16>
    %41 = arith.mulf %40, %36 : vector<128x128xbf16>
    %42 = arith.mulf %41, %36 : vector<128x128xbf16>
    %43 = arith.addf %36, %42 : vector<128x128xbf16>
    %cst_20 = arith.constant 7.968750e-01 : bf16
    %44 = vector.broadcast %cst_20 : bf16 to vector<128x128xbf16>
    %45 = arith.mulf %44, %43 : vector<128x128xbf16>
    %46 = math.tanh %45 : vector<128x128xbf16>
    %cst_21 = arith.constant 1.000000e+00 : bf16
    %47 = vector.broadcast %cst_21 : bf16 to vector<128x128xbf16>
    %48 = arith.addf %47, %46 : vector<128x128xbf16>
    %49 = arith.mulf %38, %48 : vector<128x128xbf16>
    %c0_22 = arith.constant 0 : index
    %c0_23 = arith.constant 0 : index
    %50 = vector.load %arg10[%c0_22, %c0_23] : memref<32x128xf32, #tpu.memory_space<vmem>>, vector<32x128xf32>
    %51 = arith.index_cast %c0_i32 : i32 to index
    %c0_24 = arith.constant 0 : index
    %c0_25 = arith.constant 0 : index
    %52 = vector.load %arg7[%51, %c0_24, %c0_25] : memref<1x32x128xbf16, #tpu.memory_space<vmem>>, vector<1x32x128xbf16>
    %53 = vector.shape_cast %52 : vector<1x32x128xbf16> to vector<32x128xbf16>
    %cst_26 = arith.constant dense<0.000000e+00> : vector<32x128xf32>
    %54 = tpu.matmul %53, %49, %cst_26 {dimension_numbers = #tpu.dot_dimension_numbers<[1], [0], [0], [1], [0, 0, 1, 1], [], []>} : vector<32x128xbf16>, vector<128x128xbf16>, vector<32x128xf32> -> vector<32x128xf32>
    %55 = arith.addf %50, %54 : vector<32x128xf32>
    %c0_27 = arith.constant 0 : index
    %c0_28 = arith.constant 0 : index
    %56 = vector.load %arg10[%c0_27, %c0_28] : memref<32x128xf32, #tpu.memory_space<vmem>>, vector<32x128xf32>
    tpu.vector_store %arg10[%c0_27, %c0_28], %55 {strides = array<i32>} : memref<32x128xf32, #tpu.memory_space<vmem>>, vector<32x128xf32>,
    %c1_i32 = arith.constant 1 : i32
    %c0_29 = arith.constant 0 : index
    %c0_30 = arith.constant 0 : index
    %57 = vector.load %arg10[%c0_29, %c0_30] : memref<32x128xf32, #tpu.memory_space<vmem>>, vector<32x128xf32>
    %58 = arith.addf %1, %57 : vector<32x128xf32>
    %c0_31 = arith.constant 0 : index
    %c0_32 = arith.constant 0 : index
    %59 = vector.load %arg8[%c0_31, %c0_32] : memref<32x1xf32, #tpu.memory_space<vmem>>, vector<32x1xf32>
    %60 = vector.broadcast %59 : vector<32x1xf32> to vector<32x128xf32>
    %61 = arith.addf %58, %60 : vector<32x128xf32>
    %c0_33 = arith.constant 0 : index
    %c0_34 = arith.constant 0 : index
    %c0_35 = arith.constant 0 : index
    %62 = vector.load %arg9[%c0_33, %c0_34, %c0_35] : memref<1x32x128xf32, #tpu.memory_space<vmem>>, vector<1x32x128xf32>
    %63 = vector.shape_cast %62 : vector<1x32x128xf32> to vector<32x128xf32>
    %64 = vector.shape_cast %61 : vector<32x128xf32> to vector<1x32x128xf32>
    tpu.vector_store %arg9[%c0_33, %c0_34, %c0_35], %64 {strides = array<i32>} : memref<1x32x128xf32, #tpu.memory_space<vmem>>, vector<1x32x128xf32>,
    return
  }
  func.func @transform_0(%arg0: i32, %arg1: i32) -> (i32, i32, i32) {
    %c0_i32 = arith.constant 0 : i32
    %c0_i32_0 = arith.constant 0 : i32
    return %arg0, %c0_i32, %arg1 : i32, i32, i32
  }
  func.func @transform_1(%arg0: i32, %arg1: i32) -> (i32, i32) {
    %c0_i32 = arith.constant 0 : i32
    %c0_i32_0 = arith.constant 0 : i32
    %c0_i32_1 = arith.constant 0 : i32
    return %c0_i32, %c0_i32_0 : i32, i32
  }
  func.func @transform_2(%arg0: i32, %arg1: i32) -> (i32, i32) {
    %c0_i32 = arith.constant 0 : i32
    %c0_i32_0 = arith.constant 0 : i32
    %c0_i32_1 = arith.constant 0 : i32
    return %c0_i32, %c0_i32_0 : i32, i32
  }
  func.func @transform_3(%arg0: i32, %arg1: i32) -> (i32, i32, i32) {
    %c0_i32 = arith.constant 0 : i32
    %c0_i32_0 = arith.constant 0 : i32
    %c0_i32_1 = arith.constant 0 : i32
    %c0_i32_2 = arith.constant 0 : i32
    return %c0_i32, %c0_i32_0, %c0_i32_1 : i32, i32, i32
  }
  func.func @transform_4(%arg0: i32, %arg1: i32) -> (i32, i32, i32) {
    %c0_i32 = arith.constant 0 : i32
    %c0_i32_0 = arith.constant 0 : i32
    %c0_i32_1 = arith.constant 0 : i32
    %c0_i32_2 = arith.constant 0 : i32
    return %c0_i32, %c0_i32_0, %c0_i32_1 : i32, i32, i32
  }
  func.func @transform_5(%arg0: i32, %arg1: i32) -> (i32, i32, i32) {
    %c0_i32 = arith.constant 0 : i32
    %c0_i32_0 = arith.constant 0 : i32
    %c0_i32_1 = arith.constant 0 : i32
    %c0_i32_2 = arith.constant 0 : i32
    return %c0_i32, %c0_i32_0, %c0_i32_1 : i32, i32, i32
  }
  func.func @transform_6(%arg0: i32, %arg1: i32) -> (i32, i32) {
    %c0_i32 = arith.constant 0 : i32
    %c0_i32_0 = arith.constant 0 : i32
    %c0_i32_1 = arith.constant 0 : i32
    return %c0_i32, %c0_i32_0 : i32, i32
  }
  func.func @transform_7(%arg0: i32, %arg1: i32) -> (i32, i32, i32) {
    %c0_i32 = arith.constant 0 : i32
    %c0_i32_0 = arith.constant 0 : i32
    return %arg0, %c0_i32, %arg1 : i32, i32, i32
  }
}

module attributes {stable_mosaic.version = 11 : i64} {
  func.func @_residual_ff_kernel(%arg0: i32, %arg1: i32, %arg2: memref<1x32x128xf32, #tpu.memory_space<vmem>>, %arg3: memref<32x1xf32, #tpu.memory_space<vmem>>, %arg4: memref<32x1xf32, #tpu.memory_space<vmem>>, %arg5: memref<1x128x32xbf16, #tpu.memory_space<vmem>>, %arg6: memref<1x128x1xf32, #tpu.memory_space<vmem>>, %arg7: memref<1x32x128xbf16, #tpu.memory_space<vmem>>, %arg8: memref<32x1xf32, #tpu.memory_space<vmem>>, %arg9: memref<1x32x128xf32, #tpu.memory_space<vmem>>, %arg10: memref<32x128xf32, #tpu.memory_space<vmem>>) attributes {dimension_semantics = [#tpu.dimension_semantics<parallel>, #tpu.dimension_semantics<parallel>], iteration_bounds = array<i64: 2, 1>, scalar_prefetch = 0 : i64, scratch_operands = 1 : i64, tpu.core_type = #tpu.core_type<tc>, window_params = [{transform_indices = @transform_0, window_bounds = array<i64: 1, 32, 128>}, {pipeline_mode = #tpu.pipeline_mode<synchronous>, transform_indices = @transform_1, window_bounds = array<i64: 32, 1>}, {pipeline_mode = #tpu.pipeline_mode<synchronous>, transform_indices = @transform_2, window_bounds = array<i64: 32, 1>}, {pipeline_mode = #tpu.pipeline_mode<synchronous>, transform_indices = @transform_3, window_bounds = array<i64: 1, 128, 32>}, {pipeline_mode = #tpu.pipeline_mode<synchronous>, transform_indices = @transform_4, window_bounds = array<i64: 1, 128, 1>}, {pipeline_mode = #tpu.pipeline_mode<synchronous>, transform_indices = @transform_5, window_bounds = array<i64: 1, 32, 128>}, {pipeline_mode = #tpu.pipeline_mode<synchronous>, transform_indices = @transform_6, window_bounds = array<i64: 32, 1>}, {transform_indices = @transform_7, window_bounds = array<i64: 1, 32, 128>}]} {
    %c0 = arith.constant 0 : index
    %c0_0 = arith.constant 0 : index
    %c0_1 = arith.constant 0 : index
    %0 = vector.load %arg2[%c0, %c0_0, %c0_1] : memref<1x32x128xf32, #tpu.memory_space<vmem>>, vector<1x32x128xf32>
    %1 = vector.shape_cast %0 : vector<1x32x128xf32> to vector<32x128xf32>
    %cst = arith.constant dense<0.000000e+00> : vector<128xf32>
    %2 = vector.multi_reduction <add>, %1, %cst [0] : vector<32x128xf32> to vector<128xf32>
    %3 = vector.shape_cast %2 : vector<128xf32> to vector<1x128xf32>
    %cst_2 = arith.constant 3.200000e+01 : f32
    %4 = vector.broadcast %cst_2 : f32 to vector<1x128xf32>
    %5 = arith.divf %3, %4 : vector<1x128xf32>
    %6 = vector.broadcast %5 : vector<1x128xf32> to vector<32x128xf32>
    %7 = arith.subf %1, %6 : vector<32x128xf32>
    %8 = arith.mulf %7, %7 : vector<32x128xf32>
    %cst_3 = arith.constant dense<0.000000e+00> : vector<128xf32>
    %9 = vector.multi_reduction <add>, %8, %cst_3 [0] : vector<32x128xf32> to vector<128xf32>
    %10 = vector.shape_cast %9 : vector<128xf32> to vector<1x128xf32>
    %cst_4 = arith.constant 3.200000e+01 : f32
    %11 = vector.broadcast %cst_4 : f32 to vector<1x128xf32>
    %12 = arith.divf %10, %11 : vector<1x128xf32>
    %cst_5 = arith.constant 9.99999974E-6 : f32
    %13 = vector.broadcast %cst_5 : f32 to vector<1x128xf32>
    %14 = arith.addf %12, %13 : vector<1x128xf32>
    %15 = math.rsqrt %14 : vector<1x128xf32>
    %16 = vector.broadcast %15 : vector<1x128xf32> to vector<32x128xf32>
    %17 = arith.mulf %7, %16 : vector<32x128xf32>
    %c0_6 = arith.constant 0 : index
    %c0_7 = arith.constant 0 : index
    %18 = vector.load %arg3[%c0_6, %c0_7] : memref<32x1xf32, #tpu.memory_space<vmem>>, vector<32x1xf32>
    %19 = vector.broadcast %18 : vector<32x1xf32> to vector<32x128xf32>
    %20 = arith.mulf %17, %19 : vector<32x128xf32>
    %c0_8 = arith.constant 0 : index
    %c0_9 = arith.constant 0 : index
    %21 = vector.load %arg4[%c0_8, %c0_9] : memref<32x1xf32, #tpu.memory_space<vmem>>, vector<32x1xf32>
    %22 = vector.broadcast %21 : vector<32x1xf32> to vector<32x128xf32>
    %23 = arith.addf %20, %22 : vector<32x128xf32>
    %24 = arith.truncf %23 : vector<32x128xf32> to vector<32x128xbf16>
    %cst_10 = arith.constant 0.000000e+00 : f32
    %25 = vector.broadcast %cst_10 : f32 to vector<32x128xf32>
    %c0_11 = arith.constant 0 : index
    %c0_12 = arith.constant 0 : index
    %26 = vector.load %arg10[%c0_11, %c0_12] : memref<32x128xf32, #tpu.memory_space<vmem>>, vector<32x128xf32>
    tpu.vector_store %arg10[%c0_11, %c0_12], %25 {strides = array<i32>} : memref<32x128xf32, #tpu.memory_space<vmem>>, vector<32x128xf32>,
    %c0_i32 = arith.constant 0 : i32
    %27 = arith.index_cast %c0_i32 : i32 to index
    %c0_13 = arith.constant 0 : index
    %c0_14 = arith.constant 0 : index
    %28 = vector.load %arg5[%27, %c0_13, %c0_14] : memref<1x128x32xbf16, #tpu.memory_space<vmem>>, vector<1x128x32xbf16>
    %29 = vector.shape_cast %28 : vector<1x128x32xbf16> to vector<128x32xbf16>
    %cst_15 = arith.constant dense<0.000000e+00> : vector<128x128xf32>
    %30 = tpu.matmul %29, %24, %cst_15 {dimension_numbers = #tpu.dot_dimension_numbers<[1], [0], [0], [1], [0, 0, 1, 1], [], []>} : vector<128x32xbf16>, vector<32x128xbf16>, vector<128x128xf32> -> vector<128x128xf32>
    %31 = arith.index_cast %c0_i32 : i32 to index
    %c0_16 = arith.constant 0 : index
    %c0_17 = arith.constant 0 : index
    %32 = vector.load %arg6[%31, %c0_16, %c0_17] : memref<1x128x1xf32, #tpu.memory_space<vmem>>, vector<1x128x1xf32>
    %33 = vector.shape_cast %32 : vector<1x128x1xf32> to vector<128x1xf32>
    %34 = vector.broadcast %33 : vector<128x1xf32> to vector<128x128xf32>
    %35 = arith.addf %30, %34 : vector<128x128xf32>
    %36 = arith.truncf %35 : vector<128x128xf32> to vector<128x128xbf16>
    %cst_18 = arith.constant 5.000000e-01 : bf16
    %37 = vector.broadcast %cst_18 : bf16 to vector<128x128xbf16>
    %38 = arith.mulf %37, %36 : vector<128x128xbf16>
    %cst_19 = arith.constant 4.467770e-02 : bf16
    %39 = vector.broadcast %cst_19 : bf16 to vector<128x128xbf16>
    %40 = arith.mulf %39, %36 : vector<128x128xbf16>
    %41 = arith.mulf %40, %36 : vector<128x128xbf16>
    %42 = arith.mulf %41, %36 : vector<128x128xbf16>
    %43 = arith.addf %36, %42 : vector<128x128xbf16>
    %cst_20 = arith.constant 7.968750e-01 : bf16
    %44 = vector.broadcast %cst_20 : bf16 to vector<128x128xbf16>
    %45 = arith.mulf %44, %43 : vector<128x128xbf16>
    %46 = math.tanh %45 : vector<128x128xbf16>
    %cst_21 = arith.constant 1.000000e+00 : bf16
    %47 = vector.broadcast %cst_21 : bf16 to vector<128x128xbf16>
    %48 = arith.addf %47, %46 : vector<128x128xbf16>
    %49 = arith.mulf %38, %48 : vector<128x128xbf16>
    %c0_22 = arith.constant 0 : index
    %c0_23 = arith.constant 0 : index
    %50 = vector.load %arg10[%c0_22, %c0_23] : memref<32x128xf32, #tpu.memory_space<vmem>>, vector<32x128xf32>
    %51 = arith.index_cast %c0_i32 : i32 to index
    %c0_24 = arith.constant 0 : index
    %c0_25 = arith.constant 0 : index
    %52 = vector.load %arg7[%51, %c0_24, %c0_25] : memref<1x32x128xbf16, #tpu.memory_space<vmem>>, vector<1x32x128xbf16>
    %53 = vector.shape_cast %52 : vector<1x32x128xbf16> to vector<32x128xbf16>
    %cst_26 = arith.constant dense<0.000000e+00> : vector<32x128xf32>
    %54 = tpu.matmul %53, %49, %cst_26 {dimension_numbers = #tpu.dot_dimension_numbers<[1], [0], [0], [1], [0, 0, 1, 1], [], []>} : vector<32x128xbf16>, vector<128x128xbf16>, vector<32x128xf32> -> vector<32x128xf32>
    %55 = arith.addf %50, %54 : vector<32x128xf32>
    %c0_27 = arith.constant 0 : index
    %c0_28 = arith.constant 0 : index
    %56 = vector.load %arg10[%c0_27, %c0_28] : memref<32x128xf32, #tpu.memory_space<vmem>>, vector<32x128xf32>
    tpu.vector_store %arg10[%c0_27, %c0_28], %55 {strides = array<i32>} : memref<32x128xf32, #tpu.memory_space<vmem>>, vector<32x128xf32>,
    %c1_i32 = arith.constant 1 : i32
    %c0_29 = arith.constant 0 : index
    %c0_30 = arith.constant 0 : index
    %57 = vector.load %arg10[%c0_29, %c0_30] : memref<32x128xf32, #tpu.memory_space<vmem>>, vector<32x128xf32>
    %58 = arith.addf %1, %57 : vector<32x128xf32>
    %c0_31 = arith.constant 0 : index
    %c0_32 = arith.constant 0 : index
    %59 = vector.load %arg8[%c0_31, %c0_32] : memref<32x1xf32, #tpu.memory_space<vmem>>, vector<32x1xf32>
    %60 = vector.broadcast %59 : vector<32x1xf32> to vector<32x128xf32>
    %61 = arith.addf %58, %60 : vector<32x128xf32>
    %c0_33 = arith.constant 0 : index
    %c0_34 = arith.constant 0 : index
    %c0_35 = arith.constant 0 : index
    %62 = vector.load %arg9[%c0_33, %c0_34, %c0_35] : memref<1x32x128xf32, #tpu.memory_space<vmem>>, vector<1x32x128xf32>
    %63 = vector.shape_cast %62 : vector<1x32x128xf32> to vector<32x128xf32>
    %64 = vector.shape_cast %61 : vector<32x128xf32> to vector<1x32x128xf32>
    tpu.vector_store %arg9[%c0_33, %c0_34, %c0_35], %64 {strides = array<i32>} : memref<1x32x128xf32, #tpu.memory_space<vmem>>, vector<1x32x128xf32>,
    return
  }
  func.func @transform_0(%arg0: i32, %arg1: i32) -> (i32, i32, i32) {
    %c0_i32 = arith.constant 0 : i32
    %c0_i32_0 = arith.constant 0 : i32
    return %arg0, %c0_i32, %arg1 : i32, i32, i32
  }
  func.func @transform_1(%arg0: i32, %arg1: i32) -> (i32, i32) {
    %c0_i32 = arith.constant 0 : i32
    %c0_i32_0 = arith.constant 0 : i32
    %c0_i32_1 = arith.constant 0 : i32
    return %c0_i32, %c0_i32_0 : i32, i32
  }
  func.func @transform_2(%arg0: i32, %arg1: i32) -> (i32, i32) {
    %c0_i32 = arith.constant 0 : i32
    %c0_i32_0 = arith.constant 0 : i32
    %c0_i32_1 = arith.constant 0 : i32
    return %c0_i32, %c0_i32_0 : i32, i32
  }
  func.func @transform_3(%arg0: i32, %arg1: i32) -> (i32, i32, i32) {
    %c0_i32 = arith.constant 0 : i32
    %c0_i32_0 = arith.constant 0 : i32
    %c0_i32_1 = arith.constant 0 : i32
    %c0_i32_2 = arith.constant 0 : i32
    return %c0_i32, %c0_i32_0, %c0_i32_1 : i32, i32, i32
  }
  func.func @transform_4(%arg0: i32, %arg1: i32) -> (i32, i32, i32) {
    %c0_i32 = arith.constant 0 : i32
    %c0_i32_0 = arith.constant 0 : i32
    %c0_i32_1 = arith.constant 0 : i32
    %c0_i32_2 = arith.constant 0 : i32
    return %c0_i32, %c0_i32_0, %c0_i32_1 : i32, i32, i32
  }
  func.func @transform_5(%arg0: i32, %arg1: i32) -> (i32, i32, i32) {
    %c0_i32 = arith.constant 0 : i32
    %c0_i32_0 = arith.constant 0 : i32
    %c0_i32_1 = arith.constant 0 : i32
    %c0_i32_2 = arith.constant 0 : i32
    return %c0_i32, %c0_i32_0, %c0_i32_1 : i32, i32, i32
  }
  func.func @transform_6(%arg0: i32, %arg1: i32) -> (i32, i32) {
    %c0_i32 = arith.constant 0 : i32
    %c0_i32_0 = arith.constant 0 : i32
    %c0_i32_1 = arith.constant 0 : i32
    return %c0_i32, %c0_i32_0 : i32, i32
  }
  func.func @transform_7(%arg0: i32, %arg1: i32) -> (i32, i32, i32) {
    %c0_i32 = arith.constant 0 : i32
    %c0_i32_0 = arith.constant 0 : i32
    return %arg0, %c0_i32, %arg1 : i32, i32, i32
  }
}

</mosaic_0001>

<bundles_post_ra>
// kernel: tpu_custom_call.1
= control target key start
LH: loop header
LB: loop body
LE: loop exit
PB: predicated region body
PF: predicated region fallthrough
CT: control target
= control target key end

     0   :  { %12 = vsyncpa [#allocation4], 0  ;;  %s1583_s0 = inlined_call_operand.vmem [shape: f32[2,32,128], index: 0, kind: input, shape index: {}]   ;;  %s1584_s1 = inlined_call_operand.vmem [shape: f32[32,1], index: 1, kind: input, shape index: {}]   ;;  %s1585_s2 = inlined_call_operand.vmem [shape: f32[32,1], index: 2, kind: input, shape index: {}]   ;;  %s1586_s3 = inlined_call_operand.vmem [shape: bf16[1,128,32], index: 3, kind: input, shape index: {}]   ;;  %s1587_s4 = inlined_call_operand.vmem [shape: f32[1,128,1], index: 4, kind: input, shape index: {}]   ;;  %s1588_s5 = inlined_call_operand.vmem [shape: bf16[1,32,128], index: 5, kind: input, shape index: {}]   ;;  %s1589_s6 = inlined_call_operand.vmem [shape: f32[32,1], index: 6, kind: input, shape index: {}]   ;;  %s1590_s7 = inlined_call_operand.hbm [shape: f32[2,32,128], index: 7, kind: output, shape index: {}]  }
   0x1   :  { %14 = vsyncpa [#allocation4 + $0x1], 0  ;;  %s1277_s24 = smov 0   ;;  %s1279_s25 = smov 0  }
   0x2   :  { %s1281_s26 = smov 0   ;;  %s1283_s27 = smov 0  }
   0x3   :  { %s1285_s28 = smov 0   ;;  %s1287_s29 = smov 0  }
   0x4 LB: > { %s972_s30 = sadd.s32 4294967295, %s1231_s29   ;;  %s973_s8 = sadd.s32 4294967294, %s1231_s29   ;;  %s1231_s29 = sphi %s1287_s29, %s20_s29   ;;  %s1227_s28 = sphi %s1285_s28, %s1597_s28   ;;  %s1223_s27 = sphi %s1283_s27, %s1596_s27   ;;  %s1219_s26 = sphi %s1281_s26, %s1595_s26   ;;  %s1215_s25 = sphi %s1279_s25, %s1594_s25   ;;  %s1211_s24 = sphi %s1277_s24, %s1593_s24  }
   0x5   : > { %s32_s9 = sadd.s32 1, %s1227_s28  ;;  %s195_s10 = sadd.s32 1, %s1219_s26 }
   0x6   : > { %p34_p0 = scmp.ge.s32.totalorder %s32_s9, 2  ;;  %p205_p1 = scmp.ne.s32.totalorder %s1219_s26, %s1215_s25 }
   0x7   : > { %p206_p2 = scmp.eq.s32.totalorder %s972_s30, 1  ;;  %p211_p3 = scmp.ne.s32.totalorder %s1215_s25, %s1211_s24 }
   0x8   : > { %s1599_s9 = smov (%p34_p0, %s32_s9), 0  ;;  %p212_p5 = scmp.eq.s32.totalorder %s973_s8, 1 }
   0x9   : > { %p1317_p4 = por %p206_p2, %p205_p1  ;;  %s190_s12 = ssub.s32 %s1227_s28, %s1599_s9 }
   0xa   : > { %p976_p6 = scmp.ge.s32.totalorder %s1231_s29, 1  ;;  %p193_p7 = scmp.eq.s32.totalorder %s190_s12, 0 }
   0xb   : > { %p1324_p8 = por %p212_p5, %p211_p3  ;;  %p259_p9 = scmp.lt.s32.totalorder %s1231_s29, 3 }
   0xc   : > { %s1330_s14 = scalar_select %p193_p7, %s1219_s26, %s195_s10  }
   0xd   : > { %p260_p10 = pnand %p976_p6, %p259_p9 }
   0xe   : > { %v374_v0 = vld [vmem:[%s1585_s2] sm:$0xff] (!%p260_p10)  ;;  %v1233_v2 = vmov (!%p260_p10), 0   ;;  %p294_p11 = scmp.lt.s32.totalorder (!%p260_p10), %s1223_s27, 1  ;;  %v375_v3 = vld [vmem:[%s1585_s2 + $0x8] sm:$0xff] (!%p260_p10)  ;;  %v349_v5 = vld [vmem:[%s1584_s1 + $0x18] sm:$0xff] (!%p260_p10)  ;;  %vm560_vm0 = vcmask (!%p260_p10), 261120  }
   0xf   : > { %263 = sbr.rel (%p260_p10) target bundleno = 675 (0x2a3), region = 48  ;;  %v346_v1 = vld [vmem:[%s1584_s1] sm:$0xff] (!%p260_p10)  ;;  %1124 = vset.pattern.permute.xlu1 (!%p260_p10), %v1233_v2  ;;  %1123 = vset.pattern.permute.xlu0 (!%p260_p10), %v1233_v2  ;;  %v347_v4 = vld [vmem:[%s1584_s1 + $0x8] sm:$0xff] (!%p260_p10)  ;;  %v348_v6 = vld [vmem:[%s1584_s1 + $0x10] sm:$0xff] (!%p260_p10)  ;;  %s291_s20 = sand.u32 (!%p260_p10), 1, %s1215_s25  }
  0x10   : > { %380 = vperm.xlu1 (!%p260_p10), %1124, %v374_v0   ;;  %352 = vperm.xlu0 (!%p260_p10), %1123, %v346_v1   ;;  %v377_v7 = vld [vmem:[%s1585_s2 + $0x18] sm:$0xff] (!%p260_p10)  ;;  %v376_v8 = vld [vmem:[%s1585_s2 + $0x10] sm:$0xff] (!%p260_p10)  ;;  %v425_v9 = vld [vmem:[%s1587_s4 + $0x8] sm:$0xff] (!%p260_p10)  ;;  %s1004_s22 = sshll.u32 (!%p260_p10), %s1223_s27, 9  ;;  %s1234_s16 = smov (!%p260_p10), [#allocation3]  }
  0x11   : > { %v424_v10 = vld [vmem:[%s1587_s4] sm:$0xff] (!%p260_p10)  ;;  %v427_v11 = vld [vmem:[%s1587_s4 + $0x18] sm:$0xff] (!%p260_p10)  ;;  %v426_v12 = vld [vmem:[%s1587_s4 + $0x10] sm:$0xff] (!%p260_p10)  ;;  %s1535_s10 = scalar_lea.hbm (!%p260_p10), %s1590_s7, %s1004_s22 }
  0x12   : > { %v1125_v13 = vld [vmem:[%s1586_s3] sm:$0xff] (!%p260_p10)   ;;  %v429_v16 = vld [vmem:[%s1587_s4 + $0x28] sm:$0xff] (!%p260_p10)  ;;  %v431_v20 = vld [vmem:[%s1587_s4 + $0x38] sm:$0xff] (!%p260_p10) }
  0x13   : > { %1029 = vmatprep.mubr.msk.bf16.mxu0 (!%p260_p10), %vm560_vm0, %v1125_v13  ;;  %v428_v17 = vld [vmem:[%s1587_s4 + $0x20] sm:$0xff] (!%p260_p10)  ;;  %v430_v21 = vld [vmem:[%s1587_s4 + $0x30] sm:$0xff] (!%p260_p10)  ;;  %v433_v24 = vld [vmem:[%s1587_s4 + $0x48] sm:$0xff] (!%p260_p10) }
  0x14   : > { %385 = vperm.xlu1 (!%p260_p10), %1124, %v375_v3   ;;  %357 = vperm.xlu0 (!%p260_p10), %1123, %v347_v4   ;;  %v432_v25 = vld [vmem:[%s1587_s4 + $0x40] sm:$0xff] (!%p260_p10)  ;;  %v435_v27 = vld [vmem:[%s1587_s4 + $0x58] sm:$0xff] (!%p260_p10)  ;;  %v434_v28 = vld [vmem:[%s1587_s4 + $0x50] sm:$0xff] (!%p260_p10) }
  0x15   : > { %v437_v30 = vld [vmem:[%s1587_s4 + $0x68] sm:$0xff] (!%p260_p10)  ;;  %v436_v31 = vld [vmem:[%s1587_s4 + $0x60] sm:$0xff] (!%p260_p10)  ;;  %v439_v33 = vld [vmem:[%s1587_s4 + $0x78] sm:$0xff] (!%p260_p10) }
  0x16   : > { %s295_s23 = scalar_select %p294_p11, %s1223_s27, 1  ;;  %v438_v34 = vld [vmem:[%s1587_s4 + $0x70] sm:$0xff]  ;;  %v848_v36 = vld [vmem:[%s1589_s6 + $0x8] sm:$0xff]  ;;  %v847_v37 = vld [vmem:[%s1589_s6] sm:$0xff] }
  0x17   : > { %v850_v39 = vld [vmem:[%s1589_s6 + $0x18] sm:$0xff]  ;;  %v849_v40 = vld [vmem:[%s1589_s6 + $0x10] sm:$0xff]  ;;  %s1537_s27 = scalar_lea.sflag [#allocation4], %s291_s20 }
  0x18   : > { %367 = vperm.xlu1 %1124, %v349_v5   ;;  %362 = vperm.xlu0 %1123, %v348_v6   ;;  %s1003_s19 = sshll.u32 %s295_s23, 5  ;;  %s1157_s23 = sshll.u32 %s1234_s16, 4  ;;  %s1158_s23 = int_to_ptr.vmem [resolvable:$false] %s1157_s23 }
  0x19   : > { %s301_s12 = scalar_lea.vmem %s1583_s0, %s1003_s19  ;;  %s977_s19 = sshll.u32 %s291_s20, 5 }
  0x1a   : > { %v1376_v14 = vld [vmem:[%s301_s12] sm:$0xff]  ;;  %v1378_v15 = vld [vmem:[%s301_s12 + $0x8] sm:$0xff]  ;;  %v1389_v19 = vld [vmem:[%s301_s12 + $0x10] sm:$0xff]  ;;  %s293_s21 = scalar_lea.vmem [#allocation3], %s977_s19  ;;  %s1159_s17 = scalar_lea.vmem %s1158_s23, 1024 }
  0x1b   : > { %v311_v18 = vadd.f32 %v1378_v15, %v1376_v14  ;;  %v1398_v23 = vld [vmem:[%s301_s12 + $0x18] sm:$0xff]  ;;  %s894_s12 = sshll.u32 %s293_s21, 4  ;;  %s1530_s12 = int_to_ptr.vmem [resolvable:$true] %s894_s12 }
  0x1c   : > { %395 = vperm.xlu1 %1124, %v377_v7   ;;  %390 = vperm.xlu0 %1123, %v376_v8   ;;  %s1153_s15 = scalar_lea.vmem %s1530_s12, 512  ;;  %p1160_p1 = scmp.lt.s32.totalorder %s1530_s12, %s1158_s23 }
  0x1d   : > { %v312_v22 = vadd.f32 %v311_v18, %v1389_v19  ;;  %p1154_p12 = scmp.ne.s32.totalorder %s1530_s12, %s1153_s15  ;;  %p1161_p2 = scmp.lt.s32.totalorder %s1159_s17, %s1153_s15 }
  0x1f   : > { %v313_v26 = vadd.f32 %v312_v22, %v1398_v23  ;;  %p1155_p13 = pnand %p1154_p12, %p1317_p4  ;;  %p1162_p3 = por %p1161_p2, %p1160_p1 }
  0x20   : > { %447 = vperm.xlu1 %1124, %v425_v9   ;;  %442 = vperm.xlu0 %1123, %v424_v10  }
  0x21   : > { %v314_v29 = vrot.slane %v313_v26, 4  ;;  %p1156_p0 = pneg %p1155_p13 }
  0x23   : > { %v315_v32 = vadd.f32 %v314_v29, %v313_v26  ;;  %v1126_v26 = vld [vmem:[%s1586_s3 + $0x8] sm:$0xff]   ;;  %v1129_v29 = vld [vmem:[%s1586_s3 + $0x20] sm:$0xff]   ;;  %p1163_p5 = pnand %p1162_p3, %p1156_p0 }
  0x24   : > { %457 = vperm.xlu1 %1124, %v427_v11   ;;  %452 = vperm.xlu0 %1123, %v426_v12  }
  0x25   : > { %v316_v35 = vrot.slane %v315_v32, 2 }
  0x27   : > { %v317_v38 = vadd.f32 %v316_v35, %v315_v32  ;;  %v1132_v32 = vld [vmem:[%s1586_s3 + $0x38] sm:$0xff]  }
  0x28   : > { %467 = vperm.xlu1 %1124, %v429_v16   ;;  %462 = vperm.xlu0 %1123, %v428_v17  }
  0x29   : > { %v318_v41 = vrot.slane %v317_v38, 1 }
  0x2b   : > { %v319_v42 = vadd.f32 %v318_v41, %v317_v38 }
  0x2c   : > { %477 = vperm.xlu1 %1124, %v431_v20   ;;  %472 = vperm.xlu0 %1123, %v430_v21  }
  0x2d   : > { %v321_v43 = vmul.f32 0.03125, %v319_v42 }
  0x2f   : > { %v322_v44 = vsub.f32 %v1376_v14, %v321_v43  ;;  %v323_v45 = vsub.f32 %v1378_v15, %v321_v43  ;;  %v324_v46 = vsub.f32 %v1389_v19, %v321_v43  ;;  %v325_v49 = vsub.f32 %v1398_v23, %v321_v43 }
  0x30   : > { %487 = vperm.xlu1 %1124, %v433_v24   ;;  %482 = vperm.xlu0 %1123, %v432_v25  }
  0x31   : > { %v326_v47 = vmul.f32 %v322_v44, %v322_v44  ;;  %v327_v48 = vmul.f32 %v323_v45, %v323_v45  ;;  %v328_v50 = vmul.f32 %v324_v46, %v324_v46  ;;  %v329_v52 = vmul.f32 %v325_v49, %v325_v49 }
  0x33   : > { %v330_v51 = vadd.f32 %v327_v48, %v326_v47 }
  0x34   : > { %497 = vperm.xlu1 %1124, %v435_v27   ;;  %492 = vperm.xlu0 %1123, %v434_v28   ;;  %v1127_v27 = vld [vmem:[%s1586_s3 + $0x10] sm:$0xff]   ;;  %v1128_v28 = vld [vmem:[%s1586_s3 + $0x18] sm:$0xff]  }
  0x35   : > { %v331_v53 = vadd.f32 %v330_v51, %v328_v50 }
  0x37   : > { %v332_v54 = vadd.f32 %v331_v53, %v329_v52 }
  0x38   : > { %507 = vperm.xlu1 %1124, %v437_v30   ;;  %502 = vperm.xlu0 %1123, %v436_v31   ;;  %v1130_v30 = vld [vmem:[%s1586_s3 + $0x28] sm:$0xff]   ;;  %v1131_v31 = vld [vmem:[%s1586_s3 + $0x30] sm:$0xff]  }
  0x39   : > { %v333_v55 = vrot.slane %v332_v54, 4 }
  0x3b   : > { %v334_v56 = vadd.f32 %v333_v55, %v332_v54 }
  0x3c   : > { %517 = vperm.xlu1 %1124, %v439_v33   ;;  %512 = vperm.xlu0 %1123, %v438_v34   ;;  %v1133_v33 = vld [vmem:[%s1588_s5] sm:$0xff]  }
  0x3d   : > { %v335_v57 = vrot.slane %v334_v56, 2  ;;  %1061 = vmatprep.mubr.bf16.mxu1 %v1133_v33 }
  0x3f   : > { %v336_v58 = vadd.f32 %v335_v57, %v334_v56 }
  0x40   : > { %858 = vperm.xlu1 %1124, %v848_v36   ;;  %853 = vperm.xlu0 %1123, %v847_v37  }
  0x41   : > { %v337_v59 = vrot.slane %v336_v58, 1 }
  0x43   : > { %v338_v60 = vadd.f32 %v337_v59, %v336_v58 }
  0x44   : > { %868 = vperm.xlu1 %1124, %v850_v39   ;;  %863 = vperm.xlu0 %1123, %v849_v40  }
  0x45   : > { %v339_v61 = vmul.f32 0.03125, %v338_v60 }
  0x47   : > { %v340_v62 = vadd.f32 1e-05, %v339_v61 }
  0x49   : > { %1135 = vrsqrt.f32 %v340_v62 }
  0x53   : > { %v1136_v63 = vpop.eup %1135 }
  0x54   : > { %v342_v0 = vmul.f32 %v1136_v63, %v322_v44  ;;  %v343_v3 = vmul.f32 %v1136_v63, %v323_v45  ;;  %v345_v10 = vmul.f32 %v1136_v63, %v325_v49  ;;  %v344_v11 = vmul.f32 %v1136_v63, %v324_v46 }
  0x8f   : > { %v381_v1 = vpop.permute.xlu1 %380  ;;  %v353_v2 = vpop.permute.xlu0 %352 }
  0x90   : > { %v370_v4 = vmul.f32 %v353_v2, %v342_v0 }
  0x92   : > { %v398_v8 = vadd.f32 %v381_v1, %v370_v4 }
  0x93   : > { %v386_v5 = vpop.permute.xlu1 %385  ;;  %v358_v6 = vpop.permute.xlu0 %357 }
  0x94   : > { %v371_v7 = vmul.f32 %v358_v6, %v343_v3 }
  0x96   : > { %v399_v9 = vadd.f32 %v386_v5, %v371_v7 }
  0x97   : > { %v368_v12 = vpop.permute.xlu1 %367  ;;  %v363_v13 = vpop.permute.xlu0 %362 }
  0x98   : > { %v402_v16 = vpack.c.bf16 %v399_v9, %v398_v8  ;;  %v373_v17 = vmul.f32 %v368_v12, %v345_v10  ;;  %v372_v18 = vmul.f32 %v363_v13, %v344_v11 }
  0x9a   : > { %1025 = vmatprep.subr.bf16.mxu0 %v402_v16 }
  0x9b   : > { %v396_v20 = vpop.permute.xlu1 %395  ;;  %v391_v21 = vpop.permute.xlu0 %390  ;;  %1026 = vmatpush3.bf16.msra.mxu0 %v402_v16 }
  0x9c   : > { %v401_v22 = vadd.f32 %v396_v20, %v373_v17  ;;  %v400_v24 = vadd.f32 %v391_v21, %v372_v18 }
  0x9e   : > { %v403_v25 = vpack.c.bf16 %v401_v22, %v400_v24 }
  0x9f   : > { %v448_v34 = vpop.permute.xlu1 %447  ;;  %v443_v35 = vpop.permute.xlu0 %442 }
  0xa0   : > { %1027 = vmatprep.subr.bf16.mxu0 %v403_v25 }
  0xa1   : > { %1028 = vmatpush3.bf16.msra.mxu0 %v403_v25 }
  0xa3   : > { %v458_v36 = vpop.permute.xlu1 %457  ;;  %v453_v37 = vpop.permute.xlu0 %452 }
  0xa4   : > { %1030 = vmatmul.mubr.msk.bf16.vlgmr.msra.gmra.mrb[0].mxu0 %vm560_vm0, %v1126_v26 }
  0xa5   : > { %1033 = vmatprep.mubr.msk.bf16.mxu0 %vm560_vm0, %v1127_v27 }
  0xa7   : > { %v468_v38 = vpop.permute.xlu1 %467  ;;  %v463_v39 = vpop.permute.xlu0 %462 }
  0xab   : > { %v478_v41 = vpop.permute.xlu1 %477  ;;  %v473_v43 = vpop.permute.xlu0 %472 }
  0xac   : > { %1034 = vmatmul.mubr.msk.bf16.gmra.mrb[4].mxu0 %vm560_vm0, %v1128_v28 }
  0xad   : > { %1037 = vmatprep.mubr.msk.bf16.mxu0 %vm560_vm0, %v1129_v29 }
  0xaf   : > { %v488_v52 = vpop.permute.xlu1 %487  ;;  %v483_v54 = vpop.permute.xlu0 %482 }
  0xb3   : > { %v498_v4 = vpop.permute.xlu1 %497  ;;  %v493_v7 = vpop.permute.xlu0 %492 }
  0xb4   : > { %1038 = vmatmul.mubr.msk.bf16.gmra.mrb[8].mxu0 %vm560_vm0, %v1130_v30 }
  0xb5   : > { %1041 = vmatprep.mubr.msk.bf16.mxu0 %vm560_vm0, %v1131_v31 }
  0xb7   : > { %v508_v22 = vpop.permute.xlu1 %507  ;;  %v503_v28 = vpop.permute.xlu0 %502 }
  0xbc   : > { %1042 = vmatmul.mubr.msk.bf16.gmra.mrb[12].mxu0 %vm560_vm0, %v1132_v32 }
 0x177   : > { %v1031_v40 = vpop.f32.mrb[0].mxu0 }
 0x178   : > { %v619_v42 = vpop.f32.mrb[1].mxu0  ;;  %v628_v45 = vadd.f32 %v1031_v40, %v453_v37 }
 0x179   : > { %v1032_v44 = vpop.f32.mrb[2].mxu0  ;;  %v620_v48 = vadd.f32 %v619_v42, %v443_v35 }
 0x17a   : > { %v631_v46 = vadd.f32 %v1032_v44, %v458_v36  ;;  %v622_v47 = vpop.f32.mrb[3].mxu0  ;;  %v513_v44 = vpop.permute.xlu0 %512 }
 0x17b   : > { %v623_v49 = vadd.f32 %v622_v47, %v448_v34 }
 0x17c   : > { %v1472_v50 = vpack.c.bf16 %v631_v46, %v628_v45 }
 0x17d   : > { %v1474_v51 = vpack.c.bf16 %v623_v49, %v620_v48 }
 0x17e   : > { %v699_v53 = vmul.bf16 1027030327, %v1472_v50 }
 0x17f   : > { %v1035_v55 = vpop.f32.mrb[4].mxu0  ;;  %v698_v56 = vmul.bf16 1027030327, %v1474_v51 }
 0x180   : > { %v635_v57 = vpop.f32.mrb[5].mxu0  ;;  %v707_v58 = vmul.bf16 %v699_v53, %v1472_v50  ;;  %v644_v61 = vadd.f32 %v1035_v55, %v473_v43 }
 0x181   : > { %v1036_v59 = vpop.f32.mrb[6].mxu0  ;;  %v706_v60 = vmul.bf16 %v698_v56, %v1474_v51  ;;  %v636_v1 = vadd.f32 %v635_v57, %v463_v39 }
 0x182   : > { %v647_v62 = vadd.f32 %v1036_v59, %v478_v41  ;;  %v638_v63 = vpop.f32.mrb[7].mxu0  ;;  %v715_v0 = vmul.bf16 %v707_v58, %v1472_v50  ;;  %v518_v41 = vpop.permute.xlu1 %517  ;;  %v690_v59 = vmul.bf16 1056980736, %v1474_v51 }
 0x183   : > { %v639_v2 = vadd.f32 %v638_v63, %v468_v38  ;;  %v714_v3 = vmul.bf16 %v706_v60, %v1474_v51 }
 0x184   : > { %v1482_v5 = vpack.c.bf16 %v647_v62, %v644_v61  ;;  %v723_v6 = vadd.bf16 %v715_v0, %v1472_v50 }
 0x185   : > { %v1485_v8 = vpack.c.bf16 %v639_v2, %v636_v1  ;;  %v722_v9 = vadd.bf16 %v714_v3, %v1474_v51 }
 0x186   : > { %v701_v10 = vmul.bf16 1027030327, %v1482_v5  ;;  %v731_v11 = vmul.bf16 1061961548, %v723_v6  ;;  %v691_v6 = vmul.bf16 1056980736, %v1472_v50 }
 0x187   : > { %v700_v12 = vmul.bf16 1027030327, %v1485_v8  ;;  %v1039_v13 = vpop.f32.mrb[8].mxu0  ;;  %v730_v16 = vmul.bf16 1061961548, %v722_v9 }
 0x188   : > { %v651_v17 = vpop.f32.mrb[9].mxu0  ;;  %1137 = vtanh.bf16 %v731_v11  ;;  %v709_v18 = vmul.bf16 %v701_v10, %v1482_v5  ;;  %v660_v24 = vadd.f32 %v1039_v13, %v493_v7 }
 0x189   : > { %v1040_v20 = vpop.f32.mrb[10].mxu0  ;;  %1139 = vtanh.bf16 %v730_v16  ;;  %v708_v21 = vmul.bf16 %v700_v12, %v1485_v8  ;;  %v652_v29 = vadd.f32 %v651_v17, %v483_v54 }
 0x18a   : > { %v663_v25 = vadd.f32 %v1040_v20, %v498_v4  ;;  %v654_v26 = vpop.f32.mrb[11].mxu0  ;;  %v717_v27 = vmul.bf16 %v709_v18, %v1482_v5  ;;  %v692_v18 = vmul.bf16 1056980736, %v1485_v8 }
 0x18b   : > { %v655_v30 = vadd.f32 %v654_v26, %v488_v52  ;;  %v716_v31 = vmul.bf16 %v708_v21, %v1485_v8 }
 0x18c   : > { %v1494_v32 = vpack.c.bf16 %v663_v25, %v660_v24  ;;  %v725_v33 = vadd.bf16 %v717_v27, %v1482_v5  ;;  %v693_v25 = vmul.bf16 1056980736, %v1482_v5 }
 0x18d   : > { %v1497_v34 = vpack.c.bf16 %v655_v30, %v652_v29  ;;  %v724_v35 = vadd.bf16 %v716_v31, %v1485_v8 }
 0x18e   : > { %v703_v36 = vmul.bf16 1027030327, %v1494_v32  ;;  %v733_v37 = vmul.bf16 1061961548, %v725_v33 }
 0x18f   : > { %v702_v38 = vmul.bf16 1027030327, %v1497_v34  ;;  %v1043_v39 = vpop.f32.mrb[12].mxu0  ;;  %v732_v40 = vmul.bf16 1061961548, %v724_v35 }
 0x190   : > { %v667_v42 = vpop.f32.mrb[13].mxu0  ;;  %1141 = vtanh.bf16 %v733_v37  ;;  %v711_v43 = vmul.bf16 %v703_v36, %v1494_v32  ;;  %v676_v47 = vadd.f32 %v1043_v39, %v513_v44  ;;  %v694_v30 = vmul.bf16 1056980736, %v1497_v34  ;;  %v859_v44 = vpop.permute.xlu1 %858 }
 0x191   : > { %v1044_v45 = vpop.f32.mrb[14].mxu0  ;;  %1143 = vtanh.bf16 %v732_v40  ;;  %v710_v46 = vmul.bf16 %v702_v38, %v1497_v34  ;;  %v668_v54 = vadd.f32 %v667_v42, %v503_v28  ;;  %v695_v35 = vmul.bf16 1056980736, %v1494_v32 }
 0x192   : > { %v679_v48 = vadd.f32 %v1044_v45, %v518_v41  ;;  %v670_v49 = vpop.f32.mrb[15].mxu0  ;;  %v719_v52 = vmul.bf16 %v711_v43, %v1494_v32  ;;  %v854_v43 = vpop.permute.xlu0 %853 }
 0x193   : > { %v1138_v53 = vpop.eup %1137  ;;  %v671_v55 = vadd.f32 %v670_v49, %v508_v22  ;;  %v718_v56 = vmul.bf16 %v710_v46, %v1497_v34 }
 0x194   : > { %v1140_v57 = vpop.eup %1139  ;;  %v1506_v58 = vpack.c.bf16 %v679_v48, %v676_v47  ;;  %v727_v60 = vadd.bf16 %v719_v52, %v1494_v32  ;;  %v747_v63 = vadd.bf16 1065369472, %v1138_v53  ;;  %v1134_v32 = vld [vmem:[%s1588_s5 + $0x8] sm:$0xff]  }
 0x195   : > { %v688_v61 = vpack.c.bf16 %v671_v55, %v668_v54  ;;  %v746_v62 = vadd.bf16 1065369472, %v1140_v57  ;;  %v726_v0 = vadd.bf16 %v718_v56, %v1497_v34  ;;  %v869_v56 = vpop.permute.xlu1 %868 }
 0x196   : > { %v705_v1 = vmul.bf16 1027030327, %v1506_v58  ;;  %v735_v2 = vmul.bf16 1061961548, %v727_v60  ;;  %v755_v51 = vmul.bf16 %v747_v63, %v691_v6  ;;  %v697_v34 = vmul.bf16 1056980736, %v1506_v58  ;;  %v864_v48 = vpop.permute.xlu0 %863 }
 0x197   : > { %v704_v3 = vmul.bf16 1027030327, %v688_v61  ;;  %v754_v4 = vmul.bf16 %v746_v62, %v690_v59  ;;  %v734_v7 = vmul.bf16 1061961548, %v726_v0  ;;  %v696_v38 = vmul.bf16 1056980736, %v688_v61 }
 0x198   : > { %1145 = vtanh.bf16 %v735_v2  ;;  %v713_v9 = vmul.bf16 %v705_v1, %v1506_v58 }
 0x199   : > { %1045 = vmatprep.subr.bf16.mxu1 %v754_v4  ;;  %1147 = vtanh.bf16 %v734_v7  ;;  %v712_v10 = vmul.bf16 %v704_v3, %v688_v61 }
 0x19a   : > { %1046 = vmatpush3.bf16.msra.mxu1 %v754_v4  ;;  %v721_v11 = vmul.bf16 %v713_v9, %v1506_v58 }
 0x19b   : > { %v1142_v12 = vpop.eup %1141  ;;  %1047 = vmatprep.subr.bf16.mxu1 %v755_v51  ;;  %v720_v13 = vmul.bf16 %v712_v10, %v688_v61 }
 0x19c   : > { %v1144_v16 = vpop.eup %1143  ;;  %v729_v17 = vadd.bf16 %v721_v11, %v1506_v58  ;;  %v749_v20 = vadd.bf16 1065369472, %v1142_v12 }
 0x19d   : > { %v748_v50 = vadd.bf16 1065369472, %v1144_v16  ;;  %v728_v21 = vadd.bf16 %v720_v13, %v688_v61 }
 0x19e   : > { %1048 = vmatpush3.bf16.msra.mxu1 %v755_v51  ;;  %v737_v22 = vmul.bf16 1061961548, %v729_v17  ;;  %v757_v27 = vmul.bf16 %v749_v20, %v693_v25 }
 0x19f   : > { %v756_v24 = vmul.bf16 %v748_v50, %v692_v18  ;;  %v736_v26 = vmul.bf16 1061961548, %v728_v21 }
 0x1a0   : > { %1149 = vtanh.bf16 %v737_v22 }
 0x1a1   : > { %1049 = vmatprep.subr.bf16.mxu1 %v756_v24  ;;  %1151 = vtanh.bf16 %v736_v26 }
 0x1a2   : > { %1050 = vmatpush3.bf16.msra.mxu1 %v756_v24 }
 0x1a3   : > { %v1146_v28 = vpop.eup %1145  ;;  %1051 = vmatprep.subr.bf16.mxu1 %v757_v27 }
 0x1a4   : > { %v1148_v29 = vpop.eup %1147  ;;  %v751_v31 = vadd.bf16 1065369472, %v1146_v28 }
 0x1a5   : > { %v750_v8 = vadd.bf16 1065369472, %v1148_v29 }
 0x1a6   : > { %1052 = vmatpush3.bf16.msra.mxu1 %v757_v27  ;;  %v759_v36 = vmul.bf16 %v751_v31, %v695_v35 }
 0x1a7   : > { %v758_v33 = vmul.bf16 %v750_v8, %v694_v30 }
 0x1a9   : > { %1053 = vmatprep.subr.bf16.mxu1 %v758_v33 }
 0x1aa   : > { %1054 = vmatpush3.bf16.msra.mxu1 %v758_v33 }
 0x1ab   : > { %v1150_v5 = vpop.eup %1149  ;;  %1055 = vmatprep.subr.bf16.mxu1 %v759_v36 }
 0x1ac   : > { %v1152_v37 = vpop.eup %1151  ;;  %v753_v40 = vadd.bf16 1065369472, %v1150_v5 }
 0x1ad   : > { %v752_v39 = vadd.bf16 1065369472, %v1152_v37 }
 0x1ae   : > { %1056 = vmatpush3.bf16.msra.mxu1 %v759_v36  ;;  %v761_v42 = vmul.bf16 %v753_v40, %v697_v34 }
 0x1af   : > { %v760_v41 = vmul.bf16 %v752_v39, %v696_v38 }
 0x1b1   : > { %1057 = vmatprep.subr.bf16.mxu1 %v760_v41 }
 0x1b2   : > { %1058 = vmatpush3.bf16.msra.mxu1 %v760_v41 }
 0x1b3   : > { %1059 = vmatprep.subr.bf16.mxu1 %v761_v42 }
 0x1b6   : > { %1060 = vmatpush3.bf16.msra.mxu1 %v761_v42 }
 0x1b9   : > { %1062 = vmatmul.mubr.bf16.vlgmr.msra.gmra.mrb[0].mxu1 %v1134_v32 }
 0x28c   : > { %v1063_v45 = vpop.f32.mrb[0].mxu1 }
 0x28d   : > { %v845_v46 = vadd.f32 %v1063_v45, %v1389_v19  ;;  %v816_v47 = vpop.f32.mrb[1].mxu1 }
 0x28e   : > { %v843_v49 = vadd.f32 %v816_v47, %v1376_v14  ;;  %v1064_v52 = vpop.f32.mrb[2].mxu1 }
 0x28f   : > { %v873_v53 = vadd.f32 %v864_v48, %v845_v46  ;;  %v846_v54 = vadd.f32 %v1064_v52, %v1398_v23  ;;  %v819_v55 = vpop.f32.mrb[3].mxu1 }
 0x290   : > { %v871_v57 = vadd.f32 %v854_v43, %v843_v49  ;;  %v844_v58 = vadd.f32 %v819_v55, %v1378_v15 }
 0x291   : > { %877 = vst [vmem:[%s293_s21 + $0x10] sm:$0xff] %v873_v53  ;;  %v874_v19 = vadd.f32 %v869_v56, %v846_v54 }
 0x292   : > { %875 = vst [vmem:[%s293_s21] sm:$0xff] %v871_v57  ;;  %v872_v14 = vadd.f32 %v859_v44, %v844_v58 }
 0x293   : > { %878 = vst [vmem:[%s293_s21 + $0x18] sm:$0xff] %v874_v19 }
 0x294   : > { %876 = vst [vmem:[%s293_s21 + $0x8] sm:$0xff] %v872_v14 }
 0x295   : > { %1166 = shalt.err (!%p1163_p5)
}
 0x296   : > { %s1167_s18 = scalar_lea.hbm %s1535_s10, 512  ;;  %s1171_s21 = scalar_lea.hbm %s1590_s7, 1024 }
 0x297   : > { %p1168_p6 = scmp.ne.s32.totalorder %s1535_s10, %s1167_s18  ;;  %p1172_p10 = scmp.lt.u32.totalorder %s1535_s10, %s1590_s7 }
 0x298   : > { %p1173_p11 = scmp.lt.u32.totalorder %s1171_s21, %s1167_s18  ;;  %p1175_p13 = scmp.lt.u32.totalorder %s1167_s18, %s1535_s10 }
 0x299   : > { %p1169_p7 = pnand %p1168_p6, %p1317_p4 }
 0x29a   : > { %p1174_p12 = por %p1173_p11, %p1172_p10 }
 0x29b   : > { %p1170_p9 = pneg %p1169_p7 }
 0x29c   : > { %p1176_p0 = por %p1175_p13, %p1174_p12 }
 0x29e   : > { %p1177_p1 = pnand %p1176_p0, %p1170_p9 }
 0x2a0   : > { %1180 = shalt.err (!%p1177_p1)
}
 0x2a1   : > { %s1235_s8 = smov 128   ;;  %s1236_s15 = smov 8  }
 0x2a2   : > { %1065 = dma.vmem_to_hbm [thread:$0]  (%p1317_p4), %s1530_s12, 512, %s1535_s10, %s1537_s27, %s1235_s8, %s1235_s8, %s1236_s15  }
 0x2a3 PF: > { %p1071_p2 = scmp.ge.s32.totalorder %s1231_s29, 2  ;;  %s909_s16 = sand.u32 1, %s1211_s24  }
 0x2a4   : > { %s910_s23 = scalar_lea.sflag [#allocation4], %s909_s16 }
 0x2a5   : > { %p1068_p3 = pnand %p1071_p2, %p1324_p8 }
 0x2a7   : > { %1206 = dma.done.wait (!%p1068_p3), %s910_s23, 512  }
 0x2a8   : > { %1208 = vsyncadd (!%p1068_p3), %s910_s23, 4294966784  ;;  %s20_s29 = sadd.s32 1, %s1231_s29   ;;  %s1593_s24 = smov %s1215_s25 }
 0x2a9   : > { %p17_p5 = scmp.ge.s32.totalorder %s20_s29, 4   ;;  %s1594_s25 = smov %s1219_s26 }
 0x2aa   : > { %s1595_s26 = smov %s1330_s14  ;;  %s1596_s27 = smov %s1227_s28 }
 0x2ab   : > { %s1597_s28 = smov %s1599_s9  ;;  %19 = sbr.rel (!%p17_p5) target bundleno = 4 (0x4), region = 83 }
 0x2b2   :  { %915 = vsyncpa [#allocation4], 1 }
 0x2b3   :  { %917 = vsyncpa [#allocation4 + $0x1], 1 }

// kernel: tpu_custom_call.1
= control target key start
LH: loop header
LB: loop body
LE: loop exit
PB: predicated region body
PF: predicated region fallthrough
CT: control target
= control target key end

     0   :  { %12 = vsyncpa [#allocation4], 0  ;;  %s1583_s0 = inlined_call_operand.vmem [shape: f32[2,32,128], index: 0, kind: input, shape index: {}]   ;;  %s1584_s1 = inlined_call_operand.vmem [shape: f32[32,1], index: 1, kind: input, shape index: {}]   ;;  %s1585_s2 = inlined_call_operand.vmem [shape: f32[32,1], index: 2, kind: input, shape index: {}]   ;;  %s1586_s3 = inlined_call_operand.vmem [shape: bf16[1,128,32], index: 3, kind: input, shape index: {}]   ;;  %s1587_s4 = inlined_call_operand.vmem [shape: f32[1,128,1], index: 4, kind: input, shape index: {}]   ;;  %s1588_s5 = inlined_call_operand.vmem [shape: bf16[1,32,128], index: 5, kind: input, shape index: {}]   ;;  %s1589_s6 = inlined_call_operand.vmem [shape: f32[32,1], index: 6, kind: input, shape index: {}]   ;;  %s1590_s7 = inlined_call_operand.hbm [shape: f32[2,32,128], index: 7, kind: output, shape index: {}]  }
   0x1   :  { %14 = vsyncpa [#allocation4 + $0x1], 0  ;;  %s1277_s24 = smov 0   ;;  %s1279_s25 = smov 0  }
   0x2   :  { %s1281_s26 = smov 0   ;;  %s1283_s27 = smov 0  }
   0x3   :  { %s1285_s28 = smov 0   ;;  %s1287_s29 = smov 0  }
   0x4 LB: > { %s972_s30 = sadd.s32 4294967295, %s1231_s29   ;;  %s973_s8 = sadd.s32 4294967294, %s1231_s29   ;;  %s1231_s29 = sphi %s1287_s29, %s20_s29   ;;  %s1227_s28 = sphi %s1285_s28, %s1597_s28   ;;  %s1223_s27 = sphi %s1283_s27, %s1596_s27   ;;  %s1219_s26 = sphi %s1281_s26, %s1595_s26   ;;  %s1215_s25 = sphi %s1279_s25, %s1594_s25   ;;  %s1211_s24 = sphi %s1277_s24, %s1593_s24  }
   0x5   : > { %s32_s9 = sadd.s32 1, %s1227_s28  ;;  %s195_s10 = sadd.s32 1, %s1219_s26 }
   0x6   : > { %p34_p0 = scmp.ge.s32.totalorder %s32_s9, 2  ;;  %p205_p1 = scmp.ne.s32.totalorder %s1219_s26, %s1215_s25 }
   0x7   : > { %p206_p2 = scmp.eq.s32.totalorder %s972_s30, 1  ;;  %p211_p3 = scmp.ne.s32.totalorder %s1215_s25, %s1211_s24 }
   0x8   : > { %s1599_s9 = smov (%p34_p0, %s32_s9), 0  ;;  %p212_p5 = scmp.eq.s32.totalorder %s973_s8, 1 }
   0x9   : > { %p1317_p4 = por %p206_p2, %p205_p1  ;;  %s190_s12 = ssub.s32 %s1227_s28, %s1599_s9 }
   0xa   : > { %p976_p6 = scmp.ge.s32.totalorder %s1231_s29, 1  ;;  %p193_p7 = scmp.eq.s32.totalorder %s190_s12, 0 }
   0xb   : > { %p1324_p8 = por %p212_p5, %p211_p3  ;;  %p259_p9 = scmp.lt.s32.totalorder %s1231_s29, 3 }
   0xc   : > { %s1330_s14 = scalar_select %p193_p7, %s1219_s26, %s195_s10  }
   0xd   : > { %p260_p10 = pnand %p976_p6, %p259_p9 }
   0xe   : > { %v374_v0 = vld [vmem:[%s1585_s2] sm:$0xff] (!%p260_p10)  ;;  %v1233_v2 = vmov (!%p260_p10), 0   ;;  %p294_p11 = scmp.lt.s32.totalorder (!%p260_p10), %s1223_s27, 1  ;;  %v375_v3 = vld [vmem:[%s1585_s2 + $0x8] sm:$0xff] (!%p260_p10)  ;;  %v349_v5 = vld [vmem:[%s1584_s1 + $0x18] sm:$0xff] (!%p260_p10)  ;;  %vm560_vm0 = vcmask (!%p260_p10), 261120  }
   0xf   : > { %263 = sbr.rel (%p260_p10) target bundleno = 675 (0x2a3), region = 48  ;;  %v346_v1 = vld [vmem:[%s1584_s1] sm:$0xff] (!%p260_p10)  ;;  %1124 = vset.pattern.permute.xlu1 (!%p260_p10), %v1233_v2  ;;  %1123 = vset.pattern.permute.xlu0 (!%p260_p10), %v1233_v2  ;;  %v347_v4 = vld [vmem:[%s1584_s1 + $0x8] sm:$0xff] (!%p260_p10)  ;;  %v348_v6 = vld [vmem:[%s1584_s1 + $0x10] sm:$0xff] (!%p260_p10)  ;;  %s291_s20 = sand.u32 (!%p260_p10), 1, %s1215_s25  }
  0x10   : > { %380 = vperm.xlu1 (!%p260_p10), %1124, %v374_v0   ;;  %352 = vperm.xlu0 (!%p260_p10), %1123, %v346_v1   ;;  %v377_v7 = vld [vmem:[%s1585_s2 + $0x18] sm:$0xff] (!%p260_p10)  ;;  %v376_v8 = vld [vmem:[%s1585_s2 + $0x10] sm:$0xff] (!%p260_p10)  ;;  %v425_v9 = vld [vmem:[%s1587_s4 + $0x8] sm:$0xff] (!%p260_p10)  ;;  %s1004_s22 = sshll.u32 (!%p260_p10), %s1223_s27, 9  ;;  %s1234_s16 = smov (!%p260_p10), [#allocation3]  }
  0x11   : > { %v424_v10 = vld [vmem:[%s1587_s4] sm:$0xff] (!%p260_p10)  ;;  %v427_v11 = vld [vmem:[%s1587_s4 + $0x18] sm:$0xff] (!%p260_p10)  ;;  %v426_v12 = vld [vmem:[%s1587_s4 + $0x10] sm:$0xff] (!%p260_p10)  ;;  %s1535_s10 = scalar_lea.hbm (!%p260_p10), %s1590_s7, %s1004_s22 }
  0x12   : > { %v1125_v13 = vld [vmem:[%s1586_s3] sm:$0xff] (!%p260_p10)   ;;  %v429_v16 = vld [vmem:[%s1587_s4 + $0x28] sm:$0xff] (!%p260_p10)  ;;  %v431_v20 = vld [vmem:[%s1587_s4 + $0x38] sm:$0xff] (!%p260_p10) }
  0x13   : > { %1029 = vmatprep.mubr.msk.bf16.mxu0 (!%p260_p10), %vm560_vm0, %v1125_v13  ;;  %v428_v17 = vld [vmem:[%s1587_s4 + $0x20] sm:$0xff] (!%p260_p10)  ;;  %v430_v21 = vld [vmem:[%s1587_s4 + $0x30] sm:$0xff] (!%p260_p10)  ;;  %v433_v24 = vld [vmem:[%s1587_s4 + $0x48] sm:$0xff] (!%p260_p10) }
  0x14   : > { %385 = vperm.xlu1 (!%p260_p10), %1124, %v375_v3   ;;  %357 = vperm.xlu0 (!%p260_p10), %1123, %v347_v4   ;;  %v432_v25 = vld [vmem:[%s1587_s4 + $0x40] sm:$0xff] (!%p260_p10)  ;;  %v435_v27 = vld [vmem:[%s1587_s4 + $0x58] sm:$0xff] (!%p260_p10)  ;;  %v434_v28 = vld [vmem:[%s1587_s4 + $0x50] sm:$0xff] (!%p260_p10) }
  0x15   : > { %v437_v30 = vld [vmem:[%s1587_s4 + $0x68] sm:$0xff] (!%p260_p10)  ;;  %v436_v31 = vld [vmem:[%s1587_s4 + $0x60] sm:$0xff] (!%p260_p10)  ;;  %v439_v33 = vld [vmem:[%s1587_s4 + $0x78] sm:$0xff] (!%p260_p10) }
  0x16   : > { %s295_s23 = scalar_select %p294_p11, %s1223_s27, 1  ;;  %v438_v34 = vld [vmem:[%s1587_s4 + $0x70] sm:$0xff]  ;;  %v848_v36 = vld [vmem:[%s1589_s6 + $0x8] sm:$0xff]  ;;  %v847_v37 = vld [vmem:[%s1589_s6] sm:$0xff] }
  0x17   : > { %v850_v39 = vld [vmem:[%s1589_s6 + $0x18] sm:$0xff]  ;;  %v849_v40 = vld [vmem:[%s1589_s6 + $0x10] sm:$0xff]  ;;  %s1537_s27 = scalar_lea.sflag [#allocation4], %s291_s20 }
  0x18   : > { %367 = vperm.xlu1 %1124, %v349_v5   ;;  %362 = vperm.xlu0 %1123, %v348_v6   ;;  %s1003_s19 = sshll.u32 %s295_s23, 5  ;;  %s1157_s23 = sshll.u32 %s1234_s16, 4  ;;  %s1158_s23 = int_to_ptr.vmem [resolvable:$false] %s1157_s23 }
  0x19   : > { %s301_s12 = scalar_lea.vmem %s1583_s0, %s1003_s19  ;;  %s977_s19 = sshll.u32 %s291_s20, 5 }
  0x1a   : > { %v1376_v14 = vld [vmem:[%s301_s12] sm:$0xff]  ;;  %v1378_v15 = vld [vmem:[%s301_s12 + $0x8] sm:$0xff]  ;;  %v1389_v19 = vld [vmem:[%s301_s12 + $0x10] sm:$0xff]  ;;  %s293_s21 = scalar_lea.vmem [#allocation3], %s977_s19  ;;  %s1159_s17 = scalar_lea.vmem %s1158_s23, 1024 }
  0x1b   : > { %v311_v18 = vadd.f32 %v1378_v15, %v1376_v14  ;;  %v1398_v23 = vld [vmem:[%s301_s12 + $0x18] sm:$0xff]  ;;  %s894_s12 = sshll.u32 %s293_s21, 4  ;;  %s1530_s12 = int_to_ptr.vmem [resolvable:$true] %s894_s12 }
  0x1c   : > { %395 = vperm.xlu1 %1124, %v377_v7   ;;  %390 = vperm.xlu0 %1123, %v376_v8   ;;  %s1153_s15 = scalar_lea.vmem %s1530_s12, 512  ;;  %p1160_p1 = scmp.lt.s32.totalorder %s1530_s12, %s1158_s23 }
  0x1d   : > { %v312_v22 = vadd.f32 %v311_v18, %v1389_v19  ;;  %p1154_p12 = scmp.ne.s32.totalorder %s1530_s12, %s1153_s15  ;;  %p1161_p2 = scmp.lt.s32.totalorder %s1159_s17, %s1153_s15 }
  0x1f   : > { %v313_v26 = vadd.f32 %v312_v22, %v1398_v23  ;;  %p1155_p13 = pnand %p1154_p12, %p1317_p4  ;;  %p1162_p3 = por %p1161_p2, %p1160_p1 }
  0x20   : > { %447 = vperm.xlu1 %1124, %v425_v9   ;;  %442 = vperm.xlu0 %1123, %v424_v10  }
  0x21   : > { %v314_v29 = vrot.slane %v313_v26, 4  ;;  %p1156_p0 = pneg %p1155_p13 }
  0x23   : > { %v315_v32 = vadd.f32 %v314_v29, %v313_v26  ;;  %v1126_v26 = vld [vmem:[%s1586_s3 + $0x8] sm:$0xff]   ;;  %v1129_v29 = vld [vmem:[%s1586_s3 + $0x20] sm:$0xff]   ;;  %p1163_p5 = pnand %p1162_p3, %p1156_p0 }
  0x24   : > { %457 = vperm.xlu1 %1124, %v427_v11   ;;  %452 = vperm.xlu0 %1123, %v426_v12  }
  0x25   : > { %v316_v35 = vrot.slane %v315_v32, 2 }
  0x27   : > { %v317_v38 = vadd.f32 %v316_v35, %v315_v32  ;;  %v1132_v32 = vld [vmem:[%s1586_s3 + $0x38] sm:$0xff]  }
  0x28   : > { %467 = vperm.xlu1 %1124, %v429_v16   ;;  %462 = vperm.xlu0 %1123, %v428_v17  }
  0x29   : > { %v318_v41 = vrot.slane %v317_v38, 1 }
  0x2b   : > { %v319_v42 = vadd.f32 %v318_v41, %v317_v38 }
  0x2c   : > { %477 = vperm.xlu1 %1124, %v431_v20   ;;  %472 = vperm.xlu0 %1123, %v430_v21  }
  0x2d   : > { %v321_v43 = vmul.f32 0.03125, %v319_v42 }
  0x2f   : > { %v322_v44 = vsub.f32 %v1376_v14, %v321_v43  ;;  %v323_v45 = vsub.f32 %v1378_v15, %v321_v43  ;;  %v324_v46 = vsub.f32 %v1389_v19, %v321_v43  ;;  %v325_v49 = vsub.f32 %v1398_v23, %v321_v43 }
  0x30   : > { %487 = vperm.xlu1 %1124, %v433_v24   ;;  %482 = vperm.xlu0 %1123, %v432_v25  }
  0x31   : > { %v326_v47 = vmul.f32 %v322_v44, %v322_v44  ;;  %v327_v48 = vmul.f32 %v323_v45, %v323_v45  ;;  %v328_v50 = vmul.f32 %v324_v46, %v324_v46  ;;  %v329_v52 = vmul.f32 %v325_v49, %v325_v49 }
  0x33   : > { %v330_v51 = vadd.f32 %v327_v48, %v326_v47 }
  0x34   : > { %497 = vperm.xlu1 %1124, %v435_v27   ;;  %492 = vperm.xlu0 %1123, %v434_v28   ;;  %v1127_v27 = vld [vmem:[%s1586_s3 + $0x10] sm:$0xff]   ;;  %v1128_v28 = vld [vmem:[%s1586_s3 + $0x18] sm:$0xff]  }
  0x35   : > { %v331_v53 = vadd.f32 %v330_v51, %v328_v50 }
  0x37   : > { %v332_v54 = vadd.f32 %v331_v53, %v329_v52 }
  0x38   : > { %507 = vperm.xlu1 %1124, %v437_v30   ;;  %502 = vperm.xlu0 %1123, %v436_v31   ;;  %v1130_v30 = vld [vmem:[%s1586_s3 + $0x28] sm:$0xff]   ;;  %v1131_v31 = vld [vmem:[%s1586_s3 + $0x30] sm:$0xff]  }
  0x39   : > { %v333_v55 = vrot.slane %v332_v54, 4 }
  0x3b   : > { %v334_v56 = vadd.f32 %v333_v55, %v332_v54 }
  0x3c   : > { %517 = vperm.xlu1 %1124, %v439_v33   ;;  %512 = vperm.xlu0 %1123, %v438_v34   ;;  %v1133_v33 = vld [vmem:[%s1588_s5] sm:$0xff]  }
  0x3d   : > { %v335_v57 = vrot.slane %v334_v56, 2  ;;  %1061 = vmatprep.mubr.bf16.mxu1 %v1133_v33 }
  0x3f   : > { %v336_v58 = vadd.f32 %v335_v57, %v334_v56 }
  0x40   : > { %858 = vperm.xlu1 %1124, %v848_v36   ;;  %853 = vperm.xlu0 %1123, %v847_v37  }
  0x41   : > { %v337_v59 = vrot.slane %v336_v58, 1 }
  0x43   : > { %v338_v60 = vadd.f32 %v337_v59, %v336_v58 }
  0x44   : > { %868 = vperm.xlu1 %1124, %v850_v39   ;;  %863 = vperm.xlu0 %1123, %v849_v40  }
  0x45   : > { %v339_v61 = vmul.f32 0.03125, %v338_v60 }
  0x47   : > { %v340_v62 = vadd.f32 1e-05, %v339_v61 }
  0x49   : > { %1135 = vrsqrt.f32 %v340_v62 }
  0x53   : > { %v1136_v63 = vpop.eup %1135 }
  0x54   : > { %v342_v0 = vmul.f32 %v1136_v63, %v322_v44  ;;  %v343_v3 = vmul.f32 %v1136_v63, %v323_v45  ;;  %v345_v10 = vmul.f32 %v1136_v63, %v325_v49  ;;  %v344_v11 = vmul.f32 %v1136_v63, %v324_v46 }
  0x8f   : > { %v381_v1 = vpop.permute.xlu1 %380  ;;  %v353_v2 = vpop.permute.xlu0 %352 }
  0x90   : > { %v370_v4 = vmul.f32 %v353_v2, %v342_v0 }
  0x92   : > { %v398_v8 = vadd.f32 %v381_v1, %v370_v4 }
  0x93   : > { %v386_v5 = vpop.permute.xlu1 %385  ;;  %v358_v6 = vpop.permute.xlu0 %357 }
  0x94   : > { %v371_v7 = vmul.f32 %v358_v6, %v343_v3 }
  0x96   : > { %v399_v9 = vadd.f32 %v386_v5, %v371_v7 }
  0x97   : > { %v368_v12 = vpop.permute.xlu1 %367  ;;  %v363_v13 = vpop.permute.xlu0 %362 }
  0x98   : > { %v402_v16 = vpack.c.bf16 %v399_v9, %v398_v8  ;;  %v373_v17 = vmul.f32 %v368_v12, %v345_v10  ;;  %v372_v18 = vmul.f32 %v363_v13, %v344_v11 }
  0x9a   : > { %1025 = vmatprep.subr.bf16.mxu0 %v402_v16 }
  0x9b   : > { %v396_v20 = vpop.permute.xlu1 %395  ;;  %v391_v21 = vpop.permute.xlu0 %390  ;;  %1026 = vmatpush3.bf16.msra.mxu0 %v402_v16 }
  0x9c   : > { %v401_v22 = vadd.f32 %v396_v20, %v373_v17  ;;  %v400_v24 = vadd.f32 %v391_v21, %v372_v18 }
  0x9e   : > { %v403_v25 = vpack.c.bf16 %v401_v22, %v400_v24 }
  0x9f   : > { %v448_v34 = vpop.permute.xlu1 %447  ;;  %v443_v35 = vpop.permute.xlu0 %442 }
  0xa0   : > { %1027 = vmatprep.subr.bf16.mxu0 %v403_v25 }
  0xa1   : > { %1028 = vmatpush3.bf16.msra.mxu0 %v403_v25 }
  0xa3   : > { %v458_v36 = vpop.permute.xlu1 %457  ;;  %v453_v37 = vpop.permute.xlu0 %452 }
  0xa4   : > { %1030 = vmatmul.mubr.msk.bf16.vlgmr.msra.gmra.mrb[0].mxu0 %vm560_vm0, %v1126_v26 }
  0xa5   : > { %1033 = vmatprep.mubr.msk.bf16.mxu0 %vm560_vm0, %v1127_v27 }
  0xa7   : > { %v468_v38 = vpop.permute.xlu1 %467  ;;  %v463_v39 = vpop.permute.xlu0 %462 }
  0xab   : > { %v478_v41 = vpop.permute.xlu1 %477  ;;  %v473_v43 = vpop.permute.xlu0 %472 }
  0xac   : > { %1034 = vmatmul.mubr.msk.bf16.gmra.mrb[4].mxu0 %vm560_vm0, %v1128_v28 }
  0xad   : > { %1037 = vmatprep.mubr.msk.bf16.mxu0 %vm560_vm0, %v1129_v29 }
  0xaf   : > { %v488_v52 = vpop.permute.xlu1 %487  ;;  %v483_v54 = vpop.permute.xlu0 %482 }
  0xb3   : > { %v498_v4 = vpop.permute.xlu1 %497  ;;  %v493_v7 = vpop.permute.xlu0 %492 }
  0xb4   : > { %1038 = vmatmul.mubr.msk.bf16.gmra.mrb[8].mxu0 %vm560_vm0, %v1130_v30 }
  0xb5   : > { %1041 = vmatprep.mubr.msk.bf16.mxu0 %vm560_vm0, %v1131_v31 }
  0xb7   : > { %v508_v22 = vpop.permute.xlu1 %507  ;;  %v503_v28 = vpop.permute.xlu0 %502 }
  0xbc   : > { %1042 = vmatmul.mubr.msk.bf16.gmra.mrb[12].mxu0 %vm560_vm0, %v1132_v32 }
 0x177   : > { %v1031_v40 = vpop.f32.mrb[0].mxu0 }
 0x178   : > { %v619_v42 = vpop.f32.mrb[1].mxu0  ;;  %v628_v45 = vadd.f32 %v1031_v40, %v453_v37 }
 0x179   : > { %v1032_v44 = vpop.f32.mrb[2].mxu0  ;;  %v620_v48 = vadd.f32 %v619_v42, %v443_v35 }
 0x17a   : > { %v631_v46 = vadd.f32 %v1032_v44, %v458_v36  ;;  %v622_v47 = vpop.f32.mrb[3].mxu0  ;;  %v513_v44 = vpop.permute.xlu0 %512 }
 0x17b   : > { %v623_v49 = vadd.f32 %v622_v47, %v448_v34 }
 0x17c   : > { %v1472_v50 = vpack.c.bf16 %v631_v46, %v628_v45 }
 0x17d   : > { %v1474_v51 = vpack.c.bf16 %v623_v49, %v620_v48 }
 0x17e   : > { %v699_v53 = vmul.bf16 1027030327, %v1472_v50 }
 0x17f   : > { %v1035_v55 = vpop.f32.mrb[4].mxu0  ;;  %v698_v56 = vmul.bf16 1027030327, %v1474_v51 }
 0x180   : > { %v635_v57 = vpop.f32.mrb[5].mxu0  ;;  %v707_v58 = vmul.bf16 %v699_v53, %v1472_v50  ;;  %v644_v61 = vadd.f32 %v1035_v55, %v473_v43 }
 0x181   : > { %v1036_v59 = vpop.f32.mrb[6].mxu0  ;;  %v706_v60 = vmul.bf16 %v698_v56, %v1474_v51  ;;  %v636_v1 = vadd.f32 %v635_v57, %v463_v39 }
 0x182   : > { %v647_v62 = vadd.f32 %v1036_v59, %v478_v41  ;;  %v638_v63 = vpop.f32.mrb[7].mxu0  ;;  %v715_v0 = vmul.bf16 %v707_v58, %v1472_v50  ;;  %v518_v41 = vpop.permute.xlu1 %517  ;;  %v690_v59 = vmul.bf16 1056980736, %v1474_v51 }
 0x183   : > { %v639_v2 = vadd.f32 %v638_v63, %v468_v38  ;;  %v714_v3 = vmul.bf16 %v706_v60, %v1474_v51 }
 0x184   : > { %v1482_v5 = vpack.c.bf16 %v647_v62, %v644_v61  ;;  %v723_v6 = vadd.bf16 %v715_v0, %v1472_v50 }
 0x185   : > { %v1485_v8 = vpack.c.bf16 %v639_v2, %v636_v1  ;;  %v722_v9 = vadd.bf16 %v714_v3, %v1474_v51 }
 0x186   : > { %v701_v10 = vmul.bf16 1027030327, %v1482_v5  ;;  %v731_v11 = vmul.bf16 1061961548, %v723_v6  ;;  %v691_v6 = vmul.bf16 1056980736, %v1472_v50 }
 0x187   : > { %v700_v12 = vmul.bf16 1027030327, %v1485_v8  ;;  %v1039_v13 = vpop.f32.mrb[8].mxu0  ;;  %v730_v16 = vmul.bf16 1061961548, %v722_v9 }
 0x188   : > { %v651_v17 = vpop.f32.mrb[9].mxu0  ;;  %1137 = vtanh.bf16 %v731_v11  ;;  %v709_v18 = vmul.bf16 %v701_v10, %v1482_v5  ;;  %v660_v24 = vadd.f32 %v1039_v13, %v493_v7 }
 0x189   : > { %v1040_v20 = vpop.f32.mrb[10].mxu0  ;;  %1139 = vtanh.bf16 %v730_v16  ;;  %v708_v21 = vmul.bf16 %v700_v12, %v1485_v8  ;;  %v652_v29 = vadd.f32 %v651_v17, %v483_v54 }
 0x18a   : > { %v663_v25 = vadd.f32 %v1040_v20, %v498_v4  ;;  %v654_v26 = vpop.f32.mrb[11].mxu0  ;;  %v717_v27 = vmul.bf16 %v709_v18, %v1482_v5  ;;  %v692_v18 = vmul.bf16 1056980736, %v1485_v8 }
 0x18b   : > { %v655_v30 = vadd.f32 %v654_v26, %v488_v52  ;;  %v716_v31 = vmul.bf16 %v708_v21, %v1485_v8 }
 0x18c   : > { %v1494_v32 = vpack.c.bf16 %v663_v25, %v660_v24  ;;  %v725_v33 = vadd.bf16 %v717_v27, %v1482_v5  ;;  %v693_v25 = vmul.bf16 1056980736, %v1482_v5 }
 0x18d   : > { %v1497_v34 = vpack.c.bf16 %v655_v30, %v652_v29  ;;  %v724_v35 = vadd.bf16 %v716_v31, %v1485_v8 }
 0x18e   : > { %v703_v36 = vmul.bf16 1027030327, %v1494_v32  ;;  %v733_v37 = vmul.bf16 1061961548, %v725_v33 }
 0x18f   : > { %v702_v38 = vmul.bf16 1027030327, %v1497_v34  ;;  %v1043_v39 = vpop.f32.mrb[12].mxu0  ;;  %v732_v40 = vmul.bf16 1061961548, %v724_v35 }
 0x190   : > { %v667_v42 = vpop.f32.mrb[13].mxu0  ;;  %1141 = vtanh.bf16 %v733_v37  ;;  %v711_v43 = vmul.bf16 %v703_v36, %v1494_v32  ;;  %v676_v47 = vadd.f32 %v1043_v39, %v513_v44  ;;  %v694_v30 = vmul.bf16 1056980736, %v1497_v34  ;;  %v859_v44 = vpop.permute.xlu1 %858 }
 0x191   : > { %v1044_v45 = vpop.f32.mrb[14].mxu0  ;;  %1143 = vtanh.bf16 %v732_v40  ;;  %v710_v46 = vmul.bf16 %v702_v38, %v1497_v34  ;;  %v668_v54 = vadd.f32 %v667_v42, %v503_v28  ;;  %v695_v35 = vmul.bf16 1056980736, %v1494_v32 }
 0x192   : > { %v679_v48 = vadd.f32 %v1044_v45, %v518_v41  ;;  %v670_v49 = vpop.f32.mrb[15].mxu0  ;;  %v719_v52 = vmul.bf16 %v711_v43, %v1494_v32  ;;  %v854_v43 = vpop.permute.xlu0 %853 }
 0x193   : > { %v1138_v53 = vpop.eup %1137  ;;  %v671_v55 = vadd.f32 %v670_v49, %v508_v22  ;;  %v718_v56 = vmul.bf16 %v710_v46, %v1497_v34 }
 0x194   : > { %v1140_v57 = vpop.eup %1139  ;;  %v1506_v58 = vpack.c.bf16 %v679_v48, %v676_v47  ;;  %v727_v60 = vadd.bf16 %v719_v52, %v1494_v32  ;;  %v747_v63 = vadd.bf16 1065369472, %v1138_v53  ;;  %v1134_v32 = vld [vmem:[%s1588_s5 + $0x8] sm:$0xff]  }
 0x195   : > { %v688_v61 = vpack.c.bf16 %v671_v55, %v668_v54  ;;  %v746_v62 = vadd.bf16 1065369472, %v1140_v57  ;;  %v726_v0 = vadd.bf16 %v718_v56, %v1497_v34  ;;  %v869_v56 = vpop.permute.xlu1 %868 }
 0x196   : > { %v705_v1 = vmul.bf16 1027030327, %v1506_v58  ;;  %v735_v2 = vmul.bf16 1061961548, %v727_v60  ;;  %v755_v51 = vmul.bf16 %v747_v63, %v691_v6  ;;  %v697_v34 = vmul.bf16 1056980736, %v1506_v58  ;;  %v864_v48 = vpop.permute.xlu0 %863 }
 0x197   : > { %v704_v3 = vmul.bf16 1027030327, %v688_v61  ;;  %v754_v4 = vmul.bf16 %v746_v62, %v690_v59  ;;  %v734_v7 = vmul.bf16 1061961548, %v726_v0  ;;  %v696_v38 = vmul.bf16 1056980736, %v688_v61 }
 0x198   : > { %1145 = vtanh.bf16 %v735_v2  ;;  %v713_v9 = vmul.bf16 %v705_v1, %v1506_v58 }
 0x199   : > { %1045 = vmatprep.subr.bf16.mxu1 %v754_v4  ;;  %1147 = vtanh.bf16 %v734_v7  ;;  %v712_v10 = vmul.bf16 %v704_v3, %v688_v61 }
 0x19a   : > { %1046 = vmatpush3.bf16.msra.mxu1 %v754_v4  ;;  %v721_v11 = vmul.bf16 %v713_v9, %v1506_v58 }
 0x19b   : > { %v1142_v12 = vpop.eup %1141  ;;  %1047 = vmatprep.subr.bf16.mxu1 %v755_v51  ;;  %v720_v13 = vmul.bf16 %v712_v10, %v688_v61 }
 0x19c   : > { %v1144_v16 = vpop.eup %1143  ;;  %v729_v17 = vadd.bf16 %v721_v11, %v1506_v58  ;;  %v749_v20 = vadd.bf16 1065369472, %v1142_v12 }
 0x19d   : > { %v748_v50 = vadd.bf16 1065369472, %v1144_v16  ;;  %v728_v21 = vadd.bf16 %v720_v13, %v688_v61 }
 0x19e   : > { %1048 = vmatpush3.bf16.msra.mxu1 %v755_v51  ;;  %v737_v22 = vmul.bf16 1061961548, %v729_v17  ;;  %v757_v27 = vmul.bf16 %v749_v20, %v693_v25 }
 0x19f   : > { %v756_v24 = vmul.bf16 %v748_v50, %v692_v18  ;;  %v736_v26 = vmul.bf16 1061961548, %v728_v21 }
 0x1a0   : > { %1149 = vtanh.bf16 %v737_v22 }
 0x1a1   : > { %1049 = vmatprep.subr.bf16.mxu1 %v756_v24  ;;  %1151 = vtanh.bf16 %v736_v26 }
 0x1a2   : > { %1050 = vmatpush3.bf16.msra.mxu1 %v756_v24 }
 0x1a3   : > { %v1146_v28 = vpop.eup %1145  ;;  %1051 = vmatprep.subr.bf16.mxu1 %v757_v27 }
 0x1a4   : > { %v1148_v29 = vpop.eup %1147  ;;  %v751_v31 = vadd.bf16 1065369472, %v1146_v28 }
 0x1a5   : > { %v750_v8 = vadd.bf16 1065369472, %v1148_v29 }
 0x1a6   : > { %1052 = vmatpush3.bf16.msra.mxu1 %v757_v27  ;;  %v759_v36 = vmul.bf16 %v751_v31, %v695_v35 }
 0x1a7   : > { %v758_v33 = vmul.bf16 %v750_v8, %v694_v30 }
 0x1a9   : > { %1053 = vmatprep.subr.bf16.mxu1 %v758_v33 }
 0x1aa   : > { %1054 = vmatpush3.bf16.msra.mxu1 %v758_v33 }
 0x1ab   : > { %v1150_v5 = vpop.eup %1149  ;;  %1055 = vmatprep.subr.bf16.mxu1 %v759_v36 }
 0x1ac   : > { %v1152_v37 = vpop.eup %1151  ;;  %v753_v40 = vadd.bf16 1065369472, %v1150_v5 }
 0x1ad   : > { %v752_v39 = vadd.bf16 1065369472, %v1152_v37 }
 0x1ae   : > { %1056 = vmatpush3.bf16.msra.mxu1 %v759_v36  ;;  %v761_v42 = vmul.bf16 %v753_v40, %v697_v34 }
 0x1af   : > { %v760_v41 = vmul.bf16 %v752_v39, %v696_v38 }
 0x1b1   : > { %1057 = vmatprep.subr.bf16.mxu1 %v760_v41 }
 0x1b2   : > { %1058 = vmatpush3.bf16.msra.mxu1 %v760_v41 }
 0x1b3   : > { %1059 = vmatprep.subr.bf16.mxu1 %v761_v42 }
 0x1b6   : > { %1060 = vmatpush3.bf16.msra.mxu1 %v761_v42 }
 0x1b9   : > { %1062 = vmatmul.mubr.bf16.vlgmr.msra.gmra.mrb[0].mxu1 %v1134_v32 }
 0x28c   : > { %v1063_v45 = vpop.f32.mrb[0].mxu1 }
 0x28d   : > { %v845_v46 = vadd.f32 %v1063_v45, %v1389_v19  ;;  %v816_v47 = vpop.f32.mrb[1].mxu1 }
 0x28e   : > { %v843_v49 = vadd.f32 %v816_v47, %v1376_v14  ;;  %v1064_v52 = vpop.f32.mrb[2].mxu1 }
 0x28f   : > { %v873_v53 = vadd.f32 %v864_v48, %v845_v46  ;;  %v846_v54 = vadd.f32 %v1064_v52, %v1398_v23  ;;  %v819_v55 = vpop.f32.mrb[3].mxu1 }
 0x290   : > { %v871_v57 = vadd.f32 %v854_v43, %v843_v49  ;;  %v844_v58 = vadd.f32 %v819_v55, %v1378_v15 }
 0x291   : > { %877 = vst [vmem:[%s293_s21 + $0x10] sm:$0xff] %v873_v53  ;;  %v874_v19 = vadd.f32 %v869_v56, %v846_v54 }
 0x292   : > { %875 = vst [vmem:[%s293_s21] sm:$0xff] %v871_v57  ;;  %v872_v14 = vadd.f32 %v859_v44, %v844_v58 }
 0x293   : > { %878 = vst [vmem:[%s293_s21 + $0x18] sm:$0xff] %v874_v19 }
 0x294   : > { %876 = vst [vmem:[%s293_s21 + $0x8] sm:$0xff] %v872_v14 }
 0x295   : > { %1166 = shalt.err (!%p1163_p5)
}
 0x296   : > { %s1167_s18 = scalar_lea.hbm %s1535_s10, 512  ;;  %s1171_s21 = scalar_lea.hbm %s1590_s7, 1024 }
 0x297   : > { %p1168_p6 = scmp.ne.s32.totalorder %s1535_s10, %s1167_s18  ;;  %p1172_p10 = scmp.lt.u32.totalorder %s1535_s10, %s1590_s7 }
 0x298   : > { %p1173_p11 = scmp.lt.u32.totalorder %s1171_s21, %s1167_s18  ;;  %p1175_p13 = scmp.lt.u32.totalorder %s1167_s18, %s1535_s10 }
 0x299   : > { %p1169_p7 = pnand %p1168_p6, %p1317_p4 }
 0x29a   : > { %p1174_p12 = por %p1173_p11, %p1172_p10 }
 0x29b   : > { %p1170_p9 = pneg %p1169_p7 }
 0x29c   : > { %p1176_p0 = por %p1175_p13, %p1174_p12 }
 0x29e   : > { %p1177_p1 = pnand %p1176_p0, %p1170_p9 }
 0x2a0   : > { %1180 = shalt.err (!%p1177_p1)
}
 0x2a1   : > { %s1235_s8 = smov 128   ;;  %s1236_s15 = smov 8  }
 0x2a2   : > { %1065 = dma.vmem_to_hbm [thread:$0]  (%p1317_p4), %s1530_s12, 512, %s1535_s10, %s1537_s27, %s1235_s8, %s1235_s8, %s1236_s15  }
 0x2a3 PF: > { %p1071_p2 = scmp.ge.s32.totalorder %s1231_s29, 2  ;;  %s909_s16 = sand.u32 1, %s1211_s24  }
 0x2a4   : > { %s910_s23 = scalar_lea.sflag [#allocation4], %s909_s16 }
 0x2a5   : > { %p1068_p3 = pnand %p1071_p2, %p1324_p8 }
 0x2a7   : > { %1206 = dma.done.wait (!%p1068_p3), %s910_s23, 512  }
 0x2a8   : > { %1208 = vsyncadd (!%p1068_p3), %s910_s23, 4294966784  ;;  %s20_s29 = sadd.s32 1, %s1231_s29   ;;  %s1593_s24 = smov %s1215_s25 }
 0x2a9   : > { %p17_p5 = scmp.ge.s32.totalorder %s20_s29, 4   ;;  %s1594_s25 = smov %s1219_s26 }
 0x2aa   : > { %s1595_s26 = smov %s1330_s14  ;;  %s1596_s27 = smov %s1227_s28 }
 0x2ab   : > { %s1597_s28 = smov %s1599_s9  ;;  %19 = sbr.rel (!%p17_p5) target bundleno = 4 (0x4), region = 83 }
 0x2b2   :  { %915 = vsyncpa [#allocation4], 1 }
 0x2b3   :  { %917 = vsyncpa [#allocation4 + $0x1], 1 }

</bundles_post_ra>
